<compile_context>
chip_gen: v7x
topology: tpu7x:2x2x1
jax: 0.10.0
libtpu: 0.0.40
codegen_flags: <defaults>
</compile_context>

<pallas_src>
import functools

import jax
import jax.numpy as jnp
from jax.experimental import pallas as pl
from jax.experimental.pallas import tpu as pltpu

LN_EPS = 1e-5  # torch.nn.LayerNorm default


# ----------------------------- in-kernel helpers -----------------------------

def _layernorm(x, w, b):
    mu = jnp.mean(x, axis=-1, keepdims=True)
    var = jnp.mean((x - mu) ** 2, axis=-1, keepdims=True)
    return (x - mu) * jax.lax.rsqrt(var + LN_EPS) * w + b


def _erf(x):
    # Abramowitz & Stegun 7.1.26 rational approximation (max abs err ~1.5e-7),
    # matching exact-erf torch.nn.GELU semantics to well within test tolerance.
    a1, a2, a3, a4, a5 = 0.254829592, -0.284496736, 1.421413741, -1.453152027, 1.061405429
    p = 0.3275911
    s = jnp.where(x >= 0.0, 1.0, -1.0)
    ax = jnp.abs(x)
    t = pl.reciprocal(1.0 + p * ax, approx=False)     # EUP slot instead of VPU divide
    poly = ((((a5 * t + a4) * t + a3) * t + a2) * t + a1) * t
    return s * (1.0 - poly * jnp.exp(-ax * ax))


def _gelu_exact(x):
    return 0.5 * x * (1.0 + _erf(x * 0.7071067811865475))


# ----------------------------- fused ViT kernel -----------------------------

def _fused_vit_kernel(patches_ref, pln_w, pln_b, pw, pb, pln2_w, pln2_b,
                      pos_ref, reg_ref,
                      ln1_w, ln1_b, wqkv, wo, ln2_w, ln2_b,
                      w1, b1, w2, b2,
                      fln_w, fln_b, hw, hb,
                      out_ref, x_sc,
                      *, batch, num_patches, num_reg, heads, dim_head, scale):
    l = pl.program_id(0)
    B, Np, R = batch, num_patches, num_reg
    N = Np + R
    rows, D = x_sc.shape
    inner = heads * dim_head
    dh = dim_head
    bf16 = jnp.bfloat16

    # ---- grid step 0: patch embedding + [patch ; register] token packing ----
    @pl.when(l == 0)
    def _():
        p = patches_ref[...]                                          # (B*Np, Pd) f32
        p = _layernorm(p, pln_w[...], pln_b[...])
        p = jnp.dot(p.astype(bf16), pw[...],
                    preferred_element_type=jnp.float32) + pb[...]
        p = _layernorm(p, pln2_w[...], pln2_b[...])
        p = p.reshape(B, Np, D) + pos_ref[...][None]                  # +pos per image
        reg = jnp.broadcast_to(reg_ref[...][None], (B, R, D))
        x_sc[...] = jnp.concatenate([p, reg], axis=1).reshape(rows, D)

    # ---- transformer layer `l` (this grid step's streamed weights) ----
    x = x_sc[...]                                                     # (rows, D) f32

    # attention (pre-norm, fused QKV projection)
    xn = _layernorm(x, ln1_w[0], ln1_b[0])
    qkv = jnp.dot(xn.astype(bf16), wqkv[0],
                  preferred_element_type=jnp.float32)                 # (rows, 3*inner)
    q = qkv[:, :inner]
    k = qkv[:, inner:2 * inner]
    v = qkv[:, 2 * inner:]
    head_outs = []
    for h in range(heads):                                            # static, tiny
        cs = slice(h * dh, (h + 1) * dh)
        qh = q[:, cs].reshape(B, N, dh).astype(bf16)
        kh = k[:, cs].reshape(B, N, dh).astype(bf16)
        vh = v[:, cs].reshape(B, N, dh).astype(bf16)
        dots = jnp.einsum("bqd,bkd->bqk", qh, kh,
                          preferred_element_type=jnp.float32) * scale
        dots = dots - jnp.max(dots, axis=-1, keepdims=True)           # f32 softmax
        e = jnp.exp(dots)
        inv = pl.reciprocal(jnp.sum(e, axis=-1, keepdims=True), approx=True)
        attn = (e * inv).astype(bf16)
        oh = jnp.einsum("bqk,bkd->bqd", attn, vh,
                        preferred_element_type=jnp.float32)           # (B, N, dh)
        head_outs.append(oh.reshape(rows, dh))
    o = head_outs[0] if heads == 1 else jnp.concatenate(head_outs, axis=-1)
    x = x + jnp.dot(o.astype(bf16), wo[0], preferred_element_type=jnp.float32)

    # feed-forward (pre-norm)
    xn2 = _layernorm(x, ln2_w[0], ln2_b[0])
    hdn = _gelu_exact(jnp.dot(xn2.astype(bf16), w1[0],
                              preferred_element_type=jnp.float32) + b1[0])
    x = x + jnp.dot(hdn.astype(bf16), w2[0],
                    preferred_element_type=jnp.float32) + b2[0]
    x_sc[...] = x                                                     # carry across layers

    # ---- last step: final LN, register-excluding mean pool, classifier ----
    @pl.when(l == pl.num_programs(0) - 1)
    def _():
        xf = _layernorm(x, fln_w[...], fln_b[...])
        pooled = jnp.mean(xf.reshape(B, N, D)[:, :Np, :], axis=1)     # (B, D)
        out_ref[...] = jnp.dot(pooled.astype(bf16), hw[...],
                               preferred_element_type=jnp.float32) + hb[...]


def simple_vit_forward(img, params, *, patch_size, heads, dim_head):
    B, _, H, W = img.shape
    D = params["patch_w"].shape[1]
    patches = extract_patches(img, patch_size)                        # (B, Np, Pd)
    _, Np, Pd = patches.shape
    R = params["register_tokens"].shape[0]
    N = Np + R
    L = len(params["layers"])
    inner = heads * dim_head
    mlp = params["layers"][0]["w1"].shape[1]
    C_cls = params["head_w"].shape[1]
    C_pad = 128 * pl.cdiv(C_cls, 128)                                 # lane-dense head
    rows = B * N
    bf16 = jnp.bfloat16

    pos = posemb_sincos_2d(H // patch_size, W // patch_size, D)       # (Np, D)
    patches2 = patches.reshape(B * Np, Pd)

    row = lambda vec: vec.reshape(1, -1)
    stk_mat = lambda n, dt: jnp.stack([lp[n].astype(dt) for lp in params["layers"]])
    stk_vec = lambda n: jnp.stack([lp[n].reshape(1, -1) for lp in params["layers"]])
    wqkv = jnp.stack(
        [jnp.concatenate([lp["wq"], lp["wk"], lp["wv"]], axis=-1)
         for lp in params["layers"]]).astype(bf16)                    # (L, D, 3*inner)

    hw_pad = jnp.zeros((D, C_pad), jnp.float32)
    hw_pad = hw_pad.at[:, :C_cls].set(params["head_w"]).astype(bf16)
    hb_pad = jnp.zeros((1, C_pad), jnp.float32).at[0, :C_cls].set(params["head_b"])

    def const_spec(shape):          # resident across the layer axis (loaded once)
        return pl.BlockSpec(shape, lambda l: (0,) * len(shape))

    def layer_spec(shape):          # one layer's weights per grid step (streamed)
        return pl.BlockSpec((1,) + shape, lambda l: (l,) + (0,) * len(shape))

    kernel = functools.partial(
        _fused_vit_kernel, batch=B, num_patches=Np, num_reg=R,
        heads=heads, dim_head=dim_head, scale=dim_head ** -0.5)

    in_specs = [
        const_spec((B * Np, Pd)),                          # patches
        const_spec((1, Pd)), const_spec((1, Pd)),          # patch LN
        const_spec((Pd, D)), const_spec((1, D)),           # patch linear
        const_spec((1, D)), const_spec((1, D)),            # patch LN2
        const_spec((Np, D)),                               # pos emb (per image)
        const_spec((R, D)),                                # register tokens
        layer_spec((1, D)), layer_spec((1, D)),            # ln1 w/b
        layer_spec((D, 3 * inner)),                        # fused qkv weight
        layer_spec((inner, D)),                            # attn out proj
        layer_spec((1, D)), layer_spec((1, D)),            # ln2 w/b
        layer_spec((D, mlp)), layer_spec((1, mlp)),        # w1 / b1
        layer_spec((mlp, D)), layer_spec((1, D)),          # w2 / b2
        const_spec((1, D)), const_spec((1, D)),            # final LN
        const_spec((D, C_pad)), const_spec((1, C_pad)),    # classifier head (padded)
    ]
    out_specs = pl.BlockSpec((B, C_pad), lambda l: (0, 0))  # resident; written at l==L-1

    out_pad = pl.pallas_call(
        kernel,
        out_shape=jax.ShapeDtypeStruct((B, C_pad), jnp.float32),
        grid=(L,),
        in_specs=in_specs,
        out_specs=out_specs,
        scratch_shapes=[pltpu.VMEM((rows, D), jnp.float32)],          # activation slab
        compiler_params=pltpu.CompilerParams(
            # layer axis carries the activation slab -> must be "arbitrary"
            dimension_semantics=("arbitrary",),
            # explicit budget; re-derive block sizes for v7x's 64 MiB at real sizes
            vmem_limit_bytes=32 * 1024 * 1024),
    )(patches2,
      row(params["patch_ln_w"]), row(params["patch_ln_b"]),
      params["patch_w"].astype(bf16), row(params["patch_b"]),
      row(params["patch_ln2_w"]), row(params["patch_ln2_b"]),
      pos, params["register_tokens"],
      stk_vec("ln1_w"), stk_vec("ln1_b"),
      wqkv,
      stk_mat("wo", bf16),
      stk_vec("ln2_w"), stk_vec("ln2_b"),
      stk_mat("w1", bf16), stk_vec("b1"),
      stk_mat("w2", bf16), stk_vec("b2"),
      row(params["final_ln_w"]), row(params["final_ln_b"]),
      hw_pad, hb_pad)
    return out_pad[:, :C_cls]


# ----------------------------- glue (plain JAX) -----------------------------

def posemb_sincos_2d(h, w, dim, temperature=10000, dtype=jnp.float32):
    y, x = jnp.meshgrid(jnp.arange(h), jnp.arange(w), indexing="ij")
    assert dim % 4 == 0, "feature dimension must be multiple of 4 for sincos emb"
    omega = jnp.arange(dim // 4) / (dim // 4 - 1)
    omega = 1.0 / jnp.power(float(temperature), omega)
    y = y.flatten()[:, None] * omega[None, :]
    x = x.flatten()[:, None] * omega[None, :]
    pe = jnp.concatenate((jnp.sin(x), jnp.cos(x), jnp.sin(y), jnp.cos(y)), axis=1)
    return pe.astype(dtype)


def extract_patches(img, patch_size):
    # 'b c (h p1) (w p2) -> b (h w) (p1 p2 c)'
    B, C, H, W = img.shape
    ph = pw = patch_size
    h, w = H // ph, W // pw
    x = img.reshape(B, C, h, ph, w, pw)
    x = jnp.transpose(x, (0, 2, 4, 3, 5, 1))                          # b h w p1 p2 c
    return x.reshape(B, h * w, ph * pw * C)


def init_params(key, *, channels, patch_size, dim, depth, heads, dim_head,
                mlp_dim, num_classes, num_register_tokens):
    patch_dim = channels * patch_size * patch_size
    inner = heads * dim_head
    keys = iter(jax.random.split(key, 8 + depth * 8))
    nrm = lambda shape, s=0.02: jax.random.normal(next(keys), shape, jnp.float32) * s
    p = {
        "patch_ln_w": jnp.ones((patch_dim,), jnp.float32),
        "patch_ln_b": jnp.zeros((patch_dim,), jnp.float32),
        "patch_w": nrm((patch_dim, dim)),
        "patch_b": nrm((dim,)),
        "patch_ln2_w": jnp.ones((dim,), jnp.float32),
        "patch_ln2_b": jnp.zeros((dim,), jnp.float32),
        "register_tokens": jax.random.normal(next(keys), (num_register_tokens, dim), jnp.float32),
        "final_ln_w": jnp.ones((dim,), jnp.float32),
        "final_ln_b": jnp.zeros((dim,), jnp.float32),
        "head_w": nrm((dim, num_classes)),
        "head_b": nrm((num_classes,)),
        "layers": [],
    }
    for _ in range(depth):
        p["layers"].append({
            "ln1_w": jnp.ones((dim,), jnp.float32), "ln1_b": jnp.zeros((dim,), jnp.float32),
            "wq": nrm((dim, inner)), "wk": nrm((dim, inner)), "wv": nrm((dim, inner)),
            "wo": nrm((inner, dim)),
            "ln2_w": jnp.ones((dim,), jnp.float32), "ln2_b": jnp.zeros((dim,), jnp.float32),
            "w1": nrm((dim, mlp_dim)), "b1": nrm((mlp_dim,)),
            "w2": nrm((mlp_dim, dim)), "b2": nrm((dim,)),
        })
    return p


# ------------------ pure-JAX reference (f32, for verification) ------------------

def reference_forward(img, params, *, patch_size, heads, dim_head):
    patches = extract_patches(img, patch_size)
    B, Np, _ = patches.shape
    D = params["patch_w"].shape[1]

    def ln(x, w, b):
        mu = x.mean(-1, keepdims=True)
        var = ((x - mu) ** 2).mean(-1, keepdims=True)
        return (x - mu) / jnp.sqrt(var + LN_EPS) * w + b

    x = ln(patches, params["patch_ln_w"], params["patch_ln_b"])
    x = x @ params["patch_w"] + params["patch_b"]
    x = ln(x, params["patch_ln2_w"], params["patch_ln2_b"])
    x = x + posemb_sincos_2d(img.shape[2] // patch_size, img.shape[3] // patch_size, D)
    r = jnp.broadcast_to(params["register_tokens"][None],
                         (B,) + params["register_tokens"].shape)
    x = jnp.concatenate([x, r], axis=1)
    scale = dim_head ** -0.5
    for lp in params["layers"]:
        xn = ln(x, lp["ln1_w"], lp["ln1_b"])
        q, k, v = xn @ lp["wq"], xn @ lp["wk"], xn @ lp["wv"]
        split = lambda t: t.reshape(B, -1, heads, dim_head).transpose(0, 2, 1, 3)
        q, k, v = split(q), split(k), split(v)
        dots = jnp.einsum("bhnd,bhmd->bhnm", q, k) * scale
        attn = jax.nn.softmax(dots, axis=-1)
        o = jnp.einsum("bhnm,bhmd->bhnd", attn, v)
        o = o.transpose(0, 2, 1, 3).reshape(B, -1, heads * dim_head)
        x = x + o @ lp["wo"]
        xn2 = ln(x, lp["ln2_w"], lp["ln2_b"])
        hdn = jax.nn.gelu(xn2 @ lp["w1"] + lp["b1"], approximate=False)
        x = x + hdn @ lp["w2"] + lp["b2"]
    x = ln(x, params["final_ln_w"], params["final_ln_b"])
    pooled = x[:, :Np].mean(axis=1)
    return pooled @ params["head_w"] + params["head_b"]


# ----------------------------- main -----------------------------

if __name__ == "__main__":
    B, C, H, W = 2, 3, 16, 16
    patch_size = 8
    dim, depth, heads, dim_head, mlp_dim = 64, 2, 2, 32, 128
    num_classes, num_register_tokens = 10, 4

    key = jax.random.PRNGKey(0)
    k_img, k_par = jax.random.split(key)
    img = jax.random.normal(k_img, (B, C, H, W), jnp.float32)
    params = init_params(k_par, channels=C, patch_size=patch_size, dim=dim,
                         depth=depth, heads=heads, dim_head=dim_head,
                         mlp_dim=mlp_dim, num_classes=num_classes,
                         num_register_tokens=num_register_tokens)

    out = simple_vit_forward(img, params, patch_size=patch_size,
                             heads=heads, dim_head=dim_head)
    out = jax.block_until_ready(out)

    ref = reference_forward(img, params, patch_size=patch_size,
                            heads=heads, dim_head=dim_head)
    assert out.shape == (B, num_classes), out.shape
    # Tolerance accounts for bf16 MXU operands (f32 accumulate) and the
    # hardware approximate reciprocal in the softmax denominator.
    assert jnp.allclose(out, ref, rtol=2e-2, atol=2e-2), (out, ref)
    print("KERNEL_OK")
</pallas_src>

<mosaic_0001>
module attributes {stable_mosaic.version = 11 : i64} {
  func.func @_fused_vit_kernel(%arg0: i32, %arg1: memref<8x192xf32, #tpu.memory_space<vmem>>, %arg2: memref<1x192xf32, #tpu.memory_space<vmem>>, %arg3: memref<1x192xf32, #tpu.memory_space<vmem>>, %arg4: memref<192x64xbf16, #tpu.memory_space<vmem>>, %arg5: memref<1x64xf32, #tpu.memory_space<vmem>>, %arg6: memref<1x64xf32, #tpu.memory_space<vmem>>, %arg7: memref<1x64xf32, #tpu.memory_space<vmem>>, %arg8: memref<4x64xf32, #tpu.memory_space<vmem>>, %arg9: memref<4x64xf32, #tpu.memory_space<vmem>>, %arg10: memref<1x1x64xf32, #tpu.memory_space<vmem>>, %arg11: memref<1x1x64xf32, #tpu.memory_space<vmem>>, %arg12: memref<1x64x192xbf16, #tpu.memory_space<vmem>>, %arg13: memref<1x64x64xbf16, #tpu.memory_space<vmem>>, %arg14: memref<1x1x64xf32, #tpu.memory_space<vmem>>, %arg15: memref<1x1x64xf32, #tpu.memory_space<vmem>>, %arg16: memref<1x64x128xbf16, #tpu.memory_space<vmem>>, %arg17: memref<1x1x128xf32, #tpu.memory_space<vmem>>, %arg18: memref<1x128x64xbf16, #tpu.memory_space<vmem>>, %arg19: memref<1x1x64xf32, #tpu.memory_space<vmem>>, %arg20: memref<1x64xf32, #tpu.memory_space<vmem>>, %arg21: memref<1x64xf32, #tpu.memory_space<vmem>>, %arg22: memref<64x128xbf16, #tpu.memory_space<vmem>>, %arg23: memref<1x128xf32, #tpu.memory_space<vmem>>, %arg24: memref<2x128xf32, #tpu.memory_space<vmem>>, %arg25: memref<16x64xf32, #tpu.memory_space<vmem>>) attributes {dimension_semantics = [#tpu.dimension_semantics<arbitrary>], iteration_bounds = array<i64: 2>, scalar_prefetch = 0 : i64, scratch_operands = 1 : i64, tpu.core_type = #tpu.core_type<tc>, window_params = [{pipeline_mode = #tpu.pipeline_mode<synchronous>, transform_indices = @transform_0, window_bounds = array<i64: 8, 192>}, {pipeline_mode = #tpu.pipeline_mode<synchronous>, transform_indices = @transform_1, window_bounds = array<i64: 1, 192>}, {pipeline_mode = #tpu.pipeline_mode<synchronous>, transform_indices = @transform_2, window_bounds = array<i64: 1, 192>}, {pipeline_mode = #tpu.pipeline_mode<synchronous>, transform_indices = @transform_3, window_bounds = array<i64: 192, 64>}, {pipeline_mode = #tpu.pipeline_mode<synchronous>, transform_indices = @transform_4, window_bounds = array<i64: 1, 64>}, {pipeline_mode = #tpu.pipeline_mode<synchronous>, transform_indices = @transform_5, window_bounds = array<i64: 1, 64>}, {pipeline_mode = #tpu.pipeline_mode<synchronous>, transform_indices = @transform_6, window_bounds = array<i64: 1, 64>}, {pipeline_mode = #tpu.pipeline_mode<synchronous>, transform_indices = @transform_7, window_bounds = array<i64: 4, 64>}, {pipeline_mode = #tpu.pipeline_mode<synchronous>, transform_indices = @transform_8, window_bounds = array<i64: 4, 64>}, {transform_indices = @transform_9, window_bounds = array<i64: 1, 1, 64>}, {transform_indices = @transform_10, window_bounds = array<i64: 1, 1, 64>}, {transform_indices = @transform_11, window_bounds = array<i64: 1, 64, 192>}, {transform_indices = @transform_12, window_bounds = array<i64: 1, 64, 64>}, {transform_indices = @transform_13, window_bounds = array<i64: 1, 1, 64>}, {transform_indices = @transform_14, window_bounds = array<i64: 1, 1, 64>}, {transform_indices = @transform_15, window_bounds = array<i64: 1, 64, 128>}, {transform_indices = @transform_16, window_bounds = array<i64: 1, 1, 128>}, {transform_indices = @transform_17, window_bounds = array<i64: 1, 128, 64>}, {transform_indices = @transform_18, window_bounds = array<i64: 1, 1, 64>}, {pipeline_mode = #tpu.pipeline_mode<synchronous>, transform_indices = @transform_19, window_bounds = array<i64: 1, 64>}, {pipeline_mode = #tpu.pipeline_mode<synchronous>, transform_indices = @transform_20, window_bounds = array<i64: 1, 64>}, {pipeline_mode = #tpu.pipeline_mode<synchronous>, transform_indices = @transform_21, window_bounds = array<i64: 64, 128>}, {pipeline_mode = #tpu.pipeline_mode<synchronous>, transform_indices = @transform_22, window_bounds = array<i64: 1, 128>}, {pipeline_mode = #tpu.pipeline_mode<synchronous>, transform_indices = @transform_23, window_bounds = array<i64: 2, 128>}]} {
    %c0_i32 = arith.constant 0 : i32
    %0 = arith.cmpi eq, %arg0, %c0_i32 : i32
    %1 = arith.extui %0 : i1 to i32
    %c0_i32_0 = arith.constant 0 : i32
    %2 = arith.cmpi ne, %1, %c0_i32_0 : i32
    scf.if %2 {
      %c0_73 = arith.constant 0 : index
      %c0_74 = arith.constant 0 : index
      %180 = vector.load %arg1[%c0_73, %c0_74] : memref<8x192xf32, #tpu.memory_space<vmem>>, vector<8x192xf32>
      %c0_75 = arith.constant 0 : index
      %c0_76 = arith.constant 0 : index
      %181 = vector.load %arg2[%c0_75, %c0_76] : memref<1x192xf32, #tpu.memory_space<vmem>>, vector<1x192xf32>
      %c0_77 = arith.constant 0 : index
      %c0_78 = arith.constant 0 : index
      %182 = vector.load %arg3[%c0_77, %c0_78] : memref<1x192xf32, #tpu.memory_space<vmem>>, vector<1x192xf32>
      %cst_79 = arith.constant dense<0.000000e+00> : vector<8xf32>
      %183 = vector.multi_reduction <add>, %180, %cst_79 [1] : vector<8x192xf32> to vector<8xf32>
      %184 = vector.shape_cast %183 : vector<8xf32> to vector<8x1xf32>
      %cst_80 = arith.constant 1.920000e+02 : f32
      %185 = vector.broadcast %cst_80 : f32 to vector<8x1xf32>
      %186 = arith.divf %184, %185 : vector<8x1xf32>
      %187 = vector.broadcast %186 : vector<8x1xf32> to vector<8x192xf32>
      %188 = arith.subf %180, %187 : vector<8x192xf32>
      %189 = arith.mulf %188, %188 : vector<8x192xf32>
      %cst_81 = arith.constant dense<0.000000e+00> : vector<8xf32>
      %190 = vector.multi_reduction <add>, %189, %cst_81 [1] : vector<8x192xf32> to vector<8xf32>
      %191 = vector.shape_cast %190 : vector<8xf32> to vector<8x1xf32>
      %cst_82 = arith.constant 1.920000e+02 : f32
      %192 = vector.broadcast %cst_82 : f32 to vector<8x1xf32>
      %193 = arith.divf %191, %192 : vector<8x1xf32>
      %194 = vector.broadcast %186 : vector<8x1xf32> to vector<8x192xf32>
      %195 = arith.subf %180, %194 : vector<8x192xf32>
      %cst_83 = arith.constant 9.99999974E-6 : f32
      %196 = vector.broadcast %cst_83 : f32 to vector<8x1xf32>
      %197 = arith.addf %193, %196 : vector<8x1xf32>
      %198 = math.rsqrt %197 : vector<8x1xf32>
      %199 = vector.broadcast %198 : vector<8x1xf32> to vector<8x192xf32>
      %200 = arith.mulf %195, %199 : vector<8x192xf32>
      %201 = vector.broadcast %181 : vector<1x192xf32> to vector<8x192xf32>
      %202 = arith.mulf %200, %201 : vector<8x192xf32>
      %203 = vector.broadcast %182 : vector<1x192xf32> to vector<8x192xf32>
      %204 = arith.addf %202, %203 : vector<8x192xf32>
      %205 = arith.truncf %204 : vector<8x192xf32> to vector<8x192xbf16>
      %c0_84 = arith.constant 0 : index
      %c0_85 = arith.constant 0 : index
      %206 = vector.load %arg4[%c0_84, %c0_85] : memref<192x64xbf16, #tpu.memory_space<vmem>>, vector<192x64xbf16>
      %cst_86 = arith.constant dense<0.000000e+00> : vector<8x64xf32>
      %207 = tpu.matmul %205, %206, %cst_86 {dimension_numbers = #tpu.dot_dimension_numbers<[1], [0], [0], [1], [0, 0, 1, 1], [], []>} : vector<8x192xbf16>, vector<192x64xbf16>, vector<8x64xf32> -> vector<8x64xf32>
      %c0_87 = arith.constant 0 : index
      %c0_88 = arith.constant 0 : index
      %208 = vector.load %arg5[%c0_87, %c0_88] : memref<1x64xf32, #tpu.memory_space<vmem>>, vector<1x64xf32>
      %209 = vector.broadcast %208 : vector<1x64xf32> to vector<8x64xf32>
      %210 = arith.addf %207, %209 : vector<8x64xf32>
      %c0_89 = arith.constant 0 : index
      %c0_90 = arith.constant 0 : index
      %211 = vector.load %arg6[%c0_89, %c0_90] : memref<1x64xf32, #tpu.memory_space<vmem>>, vector<1x64xf32>
      %c0_91 = arith.constant 0 : index
      %c0_92 = arith.constant 0 : index
      %212 = vector.load %arg7[%c0_91, %c0_92] : memref<1x64xf32, #tpu.memory_space<vmem>>, vector<1x64xf32>
      %cst_93 = arith.constant dense<0.000000e+00> : vector<8xf32>
      %213 = vector.multi_reduction <add>, %210, %cst_93 [1] : vector<8x64xf32> to vector<8xf32>
      %214 = vector.shape_cast %213 : vector<8xf32> to vector<8x1xf32>
      %cst_94 = arith.constant 6.400000e+01 : f32
      %215 = vector.broadcast %cst_94 : f32 to vector<8x1xf32>
      %216 = arith.divf %214, %215 : vector<8x1xf32>
      %217 = vector.broadcast %216 : vector<8x1xf32> to vector<8x64xf32>
      %218 = arith.subf %210, %217 : vector<8x64xf32>
      %219 = arith.mulf %218, %218 : vector<8x64xf32>
      %cst_95 = arith.constant dense<0.000000e+00> : vector<8xf32>
      %220 = vector.multi_reduction <add>, %219, %cst_95 [1] : vector<8x64xf32> to vector<8xf32>
      %221 = vector.shape_cast %220 : vector<8xf32> to vector<8x1xf32>
      %cst_96 = arith.constant 6.400000e+01 : f32
      %222 = vector.broadcast %cst_96 : f32 to vector<8x1xf32>
      %223 = arith.divf %221, %222 : vector<8x1xf32>
      %224 = vector.broadcast %216 : vector<8x1xf32> to vector<8x64xf32>
      %225 = arith.subf %210, %224 : vector<8x64xf32>
      %cst_97 = arith.constant 9.99999974E-6 : f32
      %226 = vector.broadcast %cst_97 : f32 to vector<8x1xf32>
      %227 = arith.addf %223, %226 : vector<8x1xf32>
      %228 = math.rsqrt %227 : vector<8x1xf32>
      %229 = vector.broadcast %228 : vector<8x1xf32> to vector<8x64xf32>
      %230 = arith.mulf %225, %229 : vector<8x64xf32>
      %231 = vector.broadcast %211 : vector<1x64xf32> to vector<8x64xf32>
      %232 = arith.mulf %230, %231 : vector<8x64xf32>
      %233 = vector.broadcast %212 : vector<1x64xf32> to vector<8x64xf32>
      %234 = arith.addf %232, %233 : vector<8x64xf32>
      %235 = vector.shape_cast %234 : vector<8x64xf32> to vector<2x4x64xf32>
      %c0_98 = arith.constant 0 : index
      %c0_99 = arith.constant 0 : index
      %236 = vector.load %arg8[%c0_98, %c0_99] : memref<4x64xf32, #tpu.memory_space<vmem>>, vector<4x64xf32>
      %237 = vector.shape_cast %236 : vector<4x64xf32> to vector<1x4x64xf32>
      %238 = vector.broadcast %237 : vector<1x4x64xf32> to vector<2x4x64xf32>
      %239 = arith.addf %235, %238 : vector<2x4x64xf32>
      %c0_100 = arith.constant 0 : index
      %c0_101 = arith.constant 0 : index
      %240 = vector.load %arg9[%c0_100, %c0_101] : memref<4x64xf32, #tpu.memory_space<vmem>>, vector<4x64xf32>
      %241 = vector.shape_cast %240 : vector<4x64xf32> to vector<1x4x64xf32>
      %242 = vector.shape_cast %241 : vector<1x4x64xf32> to vector<1x4x64xf32>
      %243 = vector.broadcast %242 : vector<1x4x64xf32> to vector<2x4x64xf32>
      %244 = tpu.concatenate %239, %243 in 1 : vector<2x4x64xf32>, vector<2x4x64xf32> -> vector<2x8x64xf32>
      %245 = vector.shape_cast %244 : vector<2x8x64xf32> to vector<16x64xf32>
      %c0_102 = arith.constant 0 : index
      %c0_103 = arith.constant 0 : index
      %246 = vector.load %arg25[%c0_102, %c0_103] : memref<16x64xf32, #tpu.memory_space<vmem>>, vector<16x64xf32>
      tpu.vector_store %arg25[%c0_102, %c0_103], %245 {strides = array<i32>} : memref<16x64xf32, #tpu.memory_space<vmem>>, vector<16x64xf32>,
    } else {
    }
    %c0 = arith.constant 0 : index
    %c0_1 = arith.constant 0 : index
    %3 = vector.load %arg25[%c0, %c0_1] : memref<16x64xf32, #tpu.memory_space<vmem>>, vector<16x64xf32>
    %c0_2 = arith.constant 0 : index
    %c0_3 = arith.constant 0 : index
    %c0_4 = arith.constant 0 : index
    %4 = vector.load %arg10[%c0_2, %c0_3, %c0_4] : memref<1x1x64xf32, #tpu.memory_space<vmem>>, vector<1x1x64xf32>
    %5 = vector.shape_cast %4 : vector<1x1x64xf32> to vector<1x64xf32>
    %c0_5 = arith.constant 0 : index
    %c0_6 = arith.constant 0 : index
    %c0_7 = arith.constant 0 : index
    %6 = vector.load %arg11[%c0_5, %c0_6, %c0_7] : memref<1x1x64xf32, #tpu.memory_space<vmem>>, vector<1x1x64xf32>
    %7 = vector.shape_cast %6 : vector<1x1x64xf32> to vector<1x64xf32>
    %cst = arith.constant dense<0.000000e+00> : vector<16xf32>
    %8 = vector.multi_reduction <add>, %3, %cst [1] : vector<16x64xf32> to vector<16xf32>
    %9 = vector.shape_cast %8 : vector<16xf32> to vector<16x1xf32>
    %cst_8 = arith.constant 6.400000e+01 : f32
    %10 = vector.broadcast %cst_8 : f32 to vector<16x1xf32>
    %11 = arith.divf %9, %10 : vector<16x1xf32>
    %12 = vector.broadcast %11 : vector<16x1xf32> to vector<16x64xf32>
    %13 = arith.subf %3, %12 : vector<16x64xf32>
    %14 = arith.mulf %13, %13 : vector<16x64xf32>
    %cst_9 = arith.constant dense<0.000000e+00> : vector<16xf32>
    %15 = vector.multi_reduction <add>, %14, %cst_9 [1] : vector<16x64xf32> to vector<16xf32>
    %16 = vector.shape_cast %15 : vector<16xf32> to vector<16x1xf32>
    %cst_10 = arith.constant 6.400000e+01 : f32
    %17 = vector.broadcast %cst_10 : f32 to vector<16x1xf32>
    %18 = arith.divf %16, %17 : vector<16x1xf32>
    %19 = vector.broadcast %11 : vector<16x1xf32> to vector<16x64xf32>
    %20 = arith.subf %3, %19 : vector<16x64xf32>
    %cst_11 = arith.constant 9.99999974E-6 : f32
    %21 = vector.broadcast %cst_11 : f32 to vector<16x1xf32>
    %22 = arith.addf %18, %21 : vector<16x1xf32>
    %23 = math.rsqrt %22 : vector<16x1xf32>
    %24 = vector.broadcast %23 : vector<16x1xf32> to vector<16x64xf32>
    %25 = arith.mulf %20, %24 : vector<16x64xf32>
    %26 = vector.broadcast %5 : vector<1x64xf32> to vector<16x64xf32>
    %27 = arith.mulf %25, %26 : vector<16x64xf32>
    %28 = vector.broadcast %7 : vector<1x64xf32> to vector<16x64xf32>
    %29 = arith.addf %27, %28 : vector<16x64xf32>
    %30 = arith.truncf %29 : vector<16x64xf32> to vector<16x64xbf16>
    %c0_12 = arith.constant 0 : index
    %c0_13 = arith.constant 0 : index
    %c0_14 = arith.constant 0 : index
    %31 = vector.load %arg12[%c0_12, %c0_13, %c0_14] : memref<1x64x192xbf16, #tpu.memory_space<vmem>>, vector<1x64x192xbf16>
    %32 = vector.shape_cast %31 : vector<1x64x192xbf16> to vector<64x192xbf16>
    %cst_15 = arith.constant dense<0.000000e+00> : vector<16x192xf32>
    %33 = tpu.matmul %30, %32, %cst_15 {dimension_numbers = #tpu.dot_dimension_numbers<[1], [0], [0], [1], [0, 0, 1, 1], [], []>} : vector<16x64xbf16>, vector<64x192xbf16>, vector<16x192xf32> -> vector<16x192xf32>
    %34 = vector.extract_strided_slice %33 {offsets = [0, 0], sizes = [16, 64], strides = [1, 1]} : vector<16x192xf32> to vector<16x64xf32>
    %35 = vector.extract_strided_slice %33 {offsets = [0, 64], sizes = [16, 64], strides = [1, 1]} : vector<16x192xf32> to vector<16x64xf32>
    %36 = vector.extract_strided_slice %33 {offsets = [0, 128], sizes = [16, 64], strides = [1, 1]} : vector<16x192xf32> to vector<16x64xf32>
    %37 = vector.extract_strided_slice %34 {offsets = [0, 0], sizes = [16, 32], strides = [1, 1]} : vector<16x64xf32> to vector<16x32xf32>
    %38 = vector.shape_cast %37 : vector<16x32xf32> to vector<2x8x32xf32>
    %39 = arith.truncf %38 : vector<2x8x32xf32> to vector<2x8x32xbf16>
    %40 = vector.extract_strided_slice %35 {offsets = [0, 0], sizes = [16, 32], strides = [1, 1]} : vector<16x64xf32> to vector<16x32xf32>
    %41 = vector.shape_cast %40 : vector<16x32xf32> to vector<2x8x32xf32>
    %42 = arith.truncf %41 : vector<2x8x32xf32> to vector<2x8x32xbf16>
    %43 = vector.extract_strided_slice %36 {offsets = [0, 0], sizes = [16, 32], strides = [1, 1]} : vector<16x64xf32> to vector<16x32xf32>
    %44 = vector.shape_cast %43 : vector<16x32xf32> to vector<2x8x32xf32>
    %45 = arith.truncf %44 : vector<2x8x32xf32> to vector<2x8x32xbf16>
    "tpu.trace_start"() <{level = 10 : i32, message = "bqd,bkd->bqk"}> : () -> ()
    %cst_16 = arith.constant dense<0.000000e+00> : vector<2x8x8xf32>
    %46 = tpu.matmul %39, %42, %cst_16 {dimension_numbers = #tpu.dot_dimension_numbers<[2], [2], [1], [1], [0, 0, 0, 1, 1, 1], [0], [0]>} : vector<2x8x32xbf16>, vector<2x8x32xbf16>, vector<2x8x8xf32> -> vector<2x8x8xf32>
    "tpu.trace_stop"() : () -> ()
    %cst_17 = arith.constant 0.176776692 : f32
    %47 = vector.broadcast %cst_17 : f32 to vector<2x8x8xf32>
    %48 = arith.mulf %46, %47 : vector<2x8x8xf32>
    %cst_18 = arith.constant dense<0xFF800000> : vector<2x8xf32>
    %49 = vector.multi_reduction <maximumf>, %48, %cst_18 [2] : vector<2x8x8xf32> to vector<2x8xf32>
    %50 = vector.shape_cast %49 : vector<2x8xf32> to vector<2x8x1xf32>
    %51 = vector.broadcast %50 : vector<2x8x1xf32> to vector<2x8x8xf32>
    %52 = arith.subf %48, %51 : vector<2x8x8xf32>
    %53 = math.exp %52 : vector<2x8x8xf32>
    %cst_19 = arith.constant dense<0.000000e+00> : vector<2x8xf32>
    %54 = vector.multi_reduction <add>, %53, %cst_19 [2] : vector<2x8x8xf32> to vector<2x8xf32>
    %55 = vector.shape_cast %54 : vector<2x8xf32> to vector<2x8x1xf32>
    %56 = tpu.reciprocal %55 {approx = true} : vector<2x8x1xf32> -> vector<2x8x1xf32>
    %57 = vector.broadcast %56 : vector<2x8x1xf32> to vector<2x8x8xf32>
    %58 = arith.mulf %53, %57 : vector<2x8x8xf32>
    %59 = arith.truncf %58 : vector<2x8x8xf32> to vector<2x8x8xbf16>
    "tpu.trace_start"() <{level = 10 : i32, message = "bqk,bkd->bqd"}> : () -> ()
    %cst_20 = arith.constant dense<0.000000e+00> : vector<2x8x32xf32>
    %60 = tpu.matmul %59, %45, %cst_20 {dimension_numbers = #tpu.dot_dimension_numbers<[2], [1], [1], [2], [0, 0, 0, 1, 1, 2], [0], [0]>} : vector<2x8x8xbf16>, vector<2x8x32xbf16>, vector<2x8x32xf32> -> vector<2x8x32xf32>
    "tpu.trace_stop"() : () -> ()
    %61 = vector.shape_cast %60 : vector<2x8x32xf32> to vector<16x32xf32>
    %62 = vector.extract_strided_slice %34 {offsets = [0, 32], sizes = [16, 32], strides = [1, 1]} : vector<16x64xf32> to vector<16x32xf32>
    %63 = vector.shape_cast %62 : vector<16x32xf32> to vector<2x8x32xf32>
    %64 = arith.truncf %63 : vector<2x8x32xf32> to vector<2x8x32xbf16>
    %65 = vector.extract_strided_slice %35 {offsets = [0, 32], sizes = [16, 32], strides = [1, 1]} : vector<16x64xf32> to vector<16x32xf32>
    %66 = vector.shape_cast %65 : vector<16x32xf32> to vector<2x8x32xf32>
    %67 = arith.truncf %66 : vector<2x8x32xf32> to vector<2x8x32xbf16>
    %68 = vector.extract_strided_slice %36 {offsets = [0, 32], sizes = [16, 32], strides = [1, 1]} : vector<16x64xf32> to vector<16x32xf32>
    %69 = vector.shape_cast %68 : vector<16x32xf32> to vector<2x8x32xf32>
    %70 = arith.truncf %69 : vector<2x8x32xf32> to vector<2x8x32xbf16>
    "tpu.trace_start"() <{level = 10 : i32, message = "bqd,bkd->bqk"}> : () -> ()
    %cst_21 = arith.constant dense<0.000000e+00> : vector<2x8x8xf32>
    %71 = tpu.matmul %64, %67, %cst_21 {dimension_numbers = #tpu.dot_dimension_numbers<[2], [2], [1], [1], [0, 0, 0, 1, 1, 1], [0], [0]>} : vector<2x8x32xbf16>, vector<2x8x32xbf16>, vector<2x8x8xf32> -> vector<2x8x8xf32>
    "tpu.trace_stop"() : () -> ()
    %cst_22 = arith.constant 0.176776692 : f32
    %72 = vector.broadcast %cst_22 : f32 to vector<2x8x8xf32>
    %73 = arith.mulf %71, %72 : vector<2x8x8xf32>
    %cst_23 = arith.constant dense<0xFF800000> : vector<2x8xf32>
    %74 = vector.multi_reduction <maximumf>, %73, %cst_23 [2] : vector<2x8x8xf32> to vector<2x8xf32>
    %75 = vector.shape_cast %74 : vector<2x8xf32> to vector<2x8x1xf32>
    %76 = vector.broadcast %75 : vector<2x8x1xf32> to vector<2x8x8xf32>
    %77 = arith.subf %73, %76 : vector<2x8x8xf32>
    %78 = math.exp %77 : vector<2x8x8xf32>
    %cst_24 = arith.constant dense<0.000000e+00> : vector<2x8xf32>
    %79 = vector.multi_reduction <add>, %78, %cst_24 [2] : vector<2x8x8xf32> to vector<2x8xf32>
    %80 = vector.shape_cast %79 : vector<2x8xf32> to vector<2x8x1xf32>
    %81 = tpu.reciprocal %80 {approx = true} : vector<2x8x1xf32> -> vector<2x8x1xf32>
    %82 = vector.broadcast %81 : vector<2x8x1xf32> to vector<2x8x8xf32>
    %83 = arith.mulf %78, %82 : vector<2x8x8xf32>
    %84 = arith.truncf %83 : vector<2x8x8xf32> to vector<2x8x8xbf16>
    "tpu.trace_start"() <{level = 10 : i32, message = "bqk,bkd->bqd"}> : () -> ()
    %cst_25 = arith.constant dense<0.000000e+00> : vector<2x8x32xf32>
    %85 = tpu.matmul %84, %70, %cst_25 {dimension_numbers = #tpu.dot_dimension_numbers<[2], [1], [1], [2], [0, 0, 0, 1, 1, 2], [0], [0]>} : vector<2x8x8xbf16>, vector<2x8x32xbf16>, vector<2x8x32xf32> -> vector<2x8x32xf32>
    "tpu.trace_stop"() : () -> ()
    %86 = vector.shape_cast %85 : vector<2x8x32xf32> to vector<16x32xf32>
    %87 = tpu.concatenate %61, %86 in 1 : vector<16x32xf32>, vector<16x32xf32> -> vector<16x64xf32>
    %88 = arith.truncf %87 : vector<16x64xf32> to vector<16x64xbf16>
    %c0_26 = arith.constant 0 : index
    %c0_27 = arith.constant 0 : index
    %c0_28 = arith.constant 0 : index
    %89 = vector.load %arg13[%c0_26, %c0_27, %c0_28] : memref<1x64x64xbf16, #tpu.memory_space<vmem>>, vector<1x64x64xbf16>
    %90 = vector.shape_cast %89 : vector<1x64x64xbf16> to vector<64x64xbf16>
    %cst_29 = arith.constant dense<0.000000e+00> : vector<16x64xf32>
    %91 = tpu.matmul %88, %90, %cst_29 {dimension_numbers = #tpu.dot_dimension_numbers<[1], [0], [0], [1], [0, 0, 1, 1], [], []>} : vector<16x64xbf16>, vector<64x64xbf16>, vector<16x64xf32> -> vector<16x64xf32>
    %92 = arith.addf %3, %91 : vector<16x64xf32>
    %c0_30 = arith.constant 0 : index
    %c0_31 = arith.constant 0 : index
    %c0_32 = arith.constant 0 : index
    %93 = vector.load %arg14[%c0_30, %c0_31, %c0_32] : memref<1x1x64xf32, #tpu.memory_space<vmem>>, vector<1x1x64xf32>
    %94 = vector.shape_cast %93 : vector<1x1x64xf32> to vector<1x64xf32>
    %c0_33 = arith.constant 0 : index
    %c0_34 = arith.constant 0 : index
    %c0_35 = arith.constant 0 : index
    %95 = vector.load %arg15[%c0_33, %c0_34, %c0_35] : memref<1x1x64xf32, #tpu.memory_space<vmem>>, vector<1x1x64xf32>
    %96 = vector.shape_cast %95 : vector<1x1x64xf32> to vector<1x64xf32>
    %cst_36 = arith.constant dense<0.000000e+00> : vector<16xf32>
    %97 = vector.multi_reduction <add>, %92, %cst_36 [1] : vector<16x64xf32> to vector<16xf32>
    %98 = vector.shape_cast %97 : vector<16xf32> to vector<16x1xf32>
    %cst_37 = arith.constant 6.400000e+01 : f32
    %99 = vector.broadcast %cst_37 : f32 to vector<16x1xf32>
    %100 = arith.divf %98, %99 : vector<16x1xf32>
    %101 = vector.broadcast %100 : vector<16x1xf32> to vector<16x64xf32>
    %102 = arith.subf %92, %101 : vector<16x64xf32>
    %103 = arith.mulf %102, %102 : vector<16x64xf32>
    %cst_38 = arith.constant dense<0.000000e+00> : vector<16xf32>
    %104 = vector.multi_reduction <add>, %103, %cst_38 [1] : vector<16x64xf32> to vector<16xf32>
    %105 = vector.shape_cast %104 : vector<16xf32> to vector<16x1xf32>
    %cst_39 = arith.constant 6.400000e+01 : f32
    %106 = vector.broadcast %cst_39 : f32 to vector<16x1xf32>
    %107 = arith.divf %105, %106 : vector<16x1xf32>
    %108 = vector.broadcast %100 : vector<16x1xf32> to vector<16x64xf32>
    %109 = arith.subf %92, %108 : vector<16x64xf32>
    %cst_40 = arith.constant 9.99999974E-6 : f32
    %110 = vector.broadcast %cst_40 : f32 to vector<16x1xf32>
    %111 = arith.addf %107, %110 : vector<16x1xf32>
    %112 = math.rsqrt %111 : vector<16x1xf32>
    %113 = vector.broadcast %112 : vector<16x1xf32> to vector<16x64xf32>
    %114 = arith.mulf %109, %113 : vector<16x64xf32>
    %115 = vector.broadcast %94 : vector<1x64xf32> to vector<16x64xf32>
    %116 = arith.mulf %114, %115 : vector<16x64xf32>
    %117 = vector.broadcast %96 : vector<1x64xf32> to vector<16x64xf32>
    %118 = arith.addf %116, %117 : vector<16x64xf32>
    %119 = arith.truncf %118 : vector<16x64xf32> to vector<16x64xbf16>
    %c0_41 = arith.constant 0 : index
    %c0_42 = arith.constant 0 : index
    %c0_43 = arith.constant 0 : index
    %120 = vector.load %arg16[%c0_41, %c0_42, %c0_43] : memref<1x64x128xbf16, #tpu.memory_space<vmem>>, vector<1x64x128xbf16>
    %121 = vector.shape_cast %120 : vector<1x64x128xbf16> to vector<64x128xbf16>
    %cst_44 = arith.constant dense<0.000000e+00> : vector<16x128xf32>
    %122 = tpu.matmul %119, %121, %cst_44 {dimension_numbers = #tpu.dot_dimension_numbers<[1], [0], [0], [1], [0, 0, 1, 1], [], []>} : vector<16x64xbf16>, vector<64x128xbf16>, vector<16x128xf32> -> vector<16x128xf32>
    %c0_45 = arith.constant 0 : index
    %c0_46 = arith.constant 0 : index
    %c0_47 = arith.constant 0 : index
    %123 = vector.load %arg17[%c0_45, %c0_46, %c0_47] : memref<1x1x128xf32, #tpu.memory_space<vmem>>, vector<1x1x128xf32>
    %124 = vector.shape_cast %123 : vector<1x1x128xf32> to vector<1x128xf32>
    %125 = vector.broadcast %124 : vector<1x128xf32> to vector<16x128xf32>
    %126 = arith.addf %122, %125 : vector<16x128xf32>
    %cst_48 = arith.constant 5.000000e-01 : f32
    %127 = vector.broadcast %cst_48 : f32 to vector<16x128xf32>
    %128 = arith.mulf %127, %126 : vector<16x128xf32>
    %cst_49 = arith.constant 0.707106769 : f32
    %129 = vector.broadcast %cst_49 : f32 to vector<16x128xf32>
    %130 = arith.mulf %126, %129 : vector<16x128xf32>
    %cst_50 = arith.constant 0.000000e+00 : f32
    %131 = vector.broadcast %cst_50 : f32 to vector<16x128xf32>
    %132 = arith.cmpf oge, %130, %131 : vector<16x128xf32>
    %cst_51 = arith.constant 1.000000e+00 : f32
    %cst_52 = arith.constant -1.000000e+00 : f32
    %133 = vector.broadcast %cst_51 : f32 to vector<16x128xf32>
    %134 = vector.broadcast %cst_52 : f32 to vector<16x128xf32>
    %135 = arith.select %132, %133, %134 : vector<16x128xi1>, vector<16x128xf32>
    %136 = math.absf %130 : vector<16x128xf32>
    %cst_53 = arith.constant 0.327591091 : f32
    %137 = vector.broadcast %cst_53 : f32 to vector<16x128xf32>
    %138 = arith.mulf %137, %136 : vector<16x128xf32>
    %cst_54 = arith.constant 1.000000e+00 : f32
    %139 = vector.broadcast %cst_54 : f32 to vector<16x128xf32>
    %140 = arith.addf %139, %138 : vector<16x128xf32>
    %141 = tpu.reciprocal %140 : vector<16x128xf32> -> vector<16x128xf32>
    %cst_55 = arith.constant 1.06140542 : f32
    %142 = vector.broadcast %cst_55 : f32 to vector<16x128xf32>
    %143 = arith.mulf %142, %141 : vector<16x128xf32>
    %cst_56 = arith.constant -1.45315206 : f32
    %144 = vector.broadcast %cst_56 : f32 to vector<16x128xf32>
    %145 = arith.addf %143, %144 : vector<16x128xf32>
    %146 = arith.mulf %145, %141 : vector<16x128xf32>
    %cst_57 = arith.constant 1.42141378 : f32
    %147 = vector.broadcast %cst_57 : f32 to vector<16x128xf32>
    %148 = arith.addf %146, %147 : vector<16x128xf32>
    %149 = arith.mulf %148, %141 : vector<16x128xf32>
    %cst_58 = arith.constant -0.284496725 : f32
    %150 = vector.broadcast %cst_58 : f32 to vector<16x128xf32>
    %151 = arith.addf %149, %150 : vector<16x128xf32>
    %152 = arith.mulf %151, %141 : vector<16x128xf32>
    %cst_59 = arith.constant 0.254829586 : f32
    %153 = vector.broadcast %cst_59 : f32 to vector<16x128xf32>
    %154 = arith.addf %152, %153 : vector<16x128xf32>
    %155 = arith.mulf %154, %141 : vector<16x128xf32>
    %cst_60 = arith.constant 0.000000e+00 : f32
    %156 = vector.broadcast %cst_60 : f32 to vector<16x128xf32>
    %157 = arith.subf %156, %136 : vector<16x128xf32>
    %158 = arith.mulf %157, %136 : vector<16x128xf32>
    %159 = math.exp %158 : vector<16x128xf32>
    %160 = arith.mulf %155, %159 : vector<16x128xf32>
    %cst_61 = arith.constant 1.000000e+00 : f32
    %161 = vector.broadcast %cst_61 : f32 to vector<16x128xf32>
    %162 = arith.subf %161, %160 : vector<16x128xf32>
    %163 = arith.mulf %135, %162 : vector<16x128xf32>
    %cst_62 = arith.constant 1.000000e+00 : f32
    %164 = vector.broadcast %cst_62 : f32 to vector<16x128xf32>
    %165 = arith.addf %164, %163 : vector<16x128xf32>
    %166 = arith.mulf %128, %165 : vector<16x128xf32>
    %167 = arith.truncf %166 : vector<16x128xf32> to vector<16x128xbf16>
    %c0_63 = arith.constant 0 : index
    %c0_64 = arith.constant 0 : index
    %c0_65 = arith.constant 0 : index
    %168 = vector.load %arg18[%c0_63, %c0_64, %c0_65] : memref<1x128x64xbf16, #tpu.memory_space<vmem>>, vector<1x128x64xbf16>
    %169 = vector.shape_cast %168 : vector<1x128x64xbf16> to vector<128x64xbf16>
    %cst_66 = arith.constant dense<0.000000e+00> : vector<16x64xf32>
    %170 = tpu.matmul %167, %169, %cst_66 {dimension_numbers = #tpu.dot_dimension_numbers<[1], [0], [0], [1], [0, 0, 1, 1], [], []>} : vector<16x128xbf16>, vector<128x64xbf16>, vector<16x64xf32> -> vector<16x64xf32>
    %171 = arith.addf %92, %170 : vector<16x64xf32>
    %c0_67 = arith.constant 0 : index
    %c0_68 = arith.constant 0 : index
    %c0_69 = arith.constant 0 : index
    %172 = vector.load %arg19[%c0_67, %c0_68, %c0_69] : memref<1x1x64xf32, #tpu.memory_space<vmem>>, vector<1x1x64xf32>
    %173 = vector.shape_cast %172 : vector<1x1x64xf32> to vector<1x64xf32>
    %174 = vector.broadcast %173 : vector<1x64xf32> to vector<16x64xf32>
    %175 = arith.addf %171, %174 : vector<16x64xf32>
    %c0_70 = arith.constant 0 : index
    %c0_71 = arith.constant 0 : index
    %176 = vector.load %arg25[%c0_70, %c0_71] : memref<16x64xf32, #tpu.memory_space<vmem>>, vector<16x64xf32>
    tpu.vector_store %arg25[%c0_70, %c0_71], %175 {strides = array<i32>} : memref<16x64xf32, #tpu.memory_space<vmem>>, vector<16x64xf32>,
    %c1_i32 = arith.constant 1 : i32
    %177 = arith.cmpi eq, %arg0, %c1_i32 : i32
    %178 = arith.extui %177 : i1 to i32
    %c0_i32_72 = arith.constant 0 : i32
    %179 = arith.cmpi ne, %178, %c0_i32_72 : i32
    scf.if %179 {
      %c0_73 = arith.constant 0 : index
      %c0_74 = arith.constant 0 : index
      %180 = vector.load %arg20[%c0_73, %c0_74] : memref<1x64xf32, #tpu.memory_space<vmem>>, vector<1x64xf32>
      %c0_75 = arith.constant 0 : index
      %c0_76 = arith.constant 0 : index
      %181 = vector.load %arg21[%c0_75, %c0_76] : memref<1x64xf32, #tpu.memory_space<vmem>>, vector<1x64xf32>
      %cst_77 = arith.constant dense<0.000000e+00> : vector<16xf32>
      %182 = vector.multi_reduction <add>, %175, %cst_77 [1] : vector<16x64xf32> to vector<16xf32>
      %183 = vector.shape_cast %182 : vector<16xf32> to vector<16x1xf32>
      %cst_78 = arith.constant 6.400000e+01 : f32
      %184 = vector.broadcast %cst_78 : f32 to vector<16x1xf32>
      %185 = arith.divf %183, %184 : vector<16x1xf32>
      %186 = vector.broadcast %185 : vector<16x1xf32> to vector<16x64xf32>
      %187 = arith.subf %175, %186 : vector<16x64xf32>
      %188 = arith.mulf %187, %187 : vector<16x64xf32>
      %cst_79 = arith.constant dense<0.000000e+00> : vector<16xf32>
      %189 = vector.multi_reduction <add>, %188, %cst_79 [1] : vector<16x64xf32> to vector<16xf32>
      %190 = vector.shape_cast %189 : vector<16xf32> to vector<16x1xf32>
      %cst_80 = arith.constant 6.400000e+01 : f32
      %191 = vector.broadcast %cst_80 : f32 to vector<16x1xf32>
      %192 = arith.divf %190, %191 : vector<16x1xf32>
      %193 = vector.broadcast %185 : vector<16x1xf32> to vector<16x64xf32>
      %194 = arith.subf %175, %193 : vector<16x64xf32>
      %cst_81 = arith.constant 9.99999974E-6 : f32
      %195 = vector.broadcast %cst_81 : f32 to vector<16x1xf32>
      %196 = arith.addf %192, %195 : vector<16x1xf32>
      %197 = math.rsqrt %196 : vector<16x1xf32>
      %198 = vector.broadcast %197 : vector<16x1xf32> to vector<16x64xf32>
      %199 = arith.mulf %194, %198 : vector<16x64xf32>
      %200 = vector.broadcast %180 : vector<1x64xf32> to vector<16x64xf32>
      %201 = arith.mulf %199, %200 : vector<16x64xf32>
      %202 = vector.broadcast %181 : vector<1x64xf32> to vector<16x64xf32>
      %203 = arith.addf %201, %202 : vector<16x64xf32>
      %204 = vector.shape_cast %203 : vector<16x64xf32> to vector<2x8x64xf32>
      %205 = vector.extract_strided_slice %204 {offsets = [0, 0, 0], sizes = [2, 4, 64], strides = [1, 1, 1]} : vector<2x8x64xf32> to vector<2x4x64xf32>
      %cst_82 = arith.constant dense<0.000000e+00> : vector<2x64xf32>
      %206 = vector.multi_reduction <add>, %205, %cst_82 [1] : vector<2x4x64xf32> to vector<2x64xf32>
      %cst_83 = arith.constant 4.000000e+00 : f32
      %207 = vector.broadcast %cst_83 : f32 to vector<2x64xf32>
      %208 = arith.divf %206, %207 : vector<2x64xf32>
      %209 = arith.truncf %208 : vector<2x64xf32> to vector<2x64xbf16>
      %c0_84 = arith.constant 0 : index
      %c0_85 = arith.constant 0 : index
      %210 = vector.load %arg22[%c0_84, %c0_85] : memref<64x128xbf16, #tpu.memory_space<vmem>>, vector<64x128xbf16>
      %cst_86 = arith.constant dense<0.000000e+00> : vector<2x128xf32>
      %211 = tpu.matmul %209, %210, %cst_86 {dimension_numbers = #tpu.dot_dimension_numbers<[1], [0], [0], [1], [0, 0, 1, 1], [], []>} : vector<2x64xbf16>, vector<64x128xbf16>, vector<2x128xf32> -> vector<2x128xf32>
      %c0_87 = arith.constant 0 : index
      %c0_88 = arith.constant 0 : index
      %212 = vector.load %arg23[%c0_87, %c0_88] : memref<1x128xf32, #tpu.memory_space<vmem>>, vector<1x128xf32>
      %213 = vector.broadcast %212 : vector<1x128xf32> to vector<2x128xf32>
      %214 = arith.addf %211, %213 : vector<2x128xf32>
      %c0_89 = arith.constant 0 : index
      %c0_90 = arith.constant 0 : index
      %215 = vector.load %arg24[%c0_89, %c0_90] : memref<2x128xf32, #tpu.memory_space<vmem>>, vector<2x128xf32>
      tpu.vector_store %arg24[%c0_89, %c0_90], %214 {strides = array<i32>} : memref<2x128xf32, #tpu.memory_space<vmem>>, vector<2x128xf32>,
    } else {
    }
    return
  }
  func.func @transform_0(%arg0: i32) -> (i32, i32) {
    %c0_i32 = arith.constant 0 : i32
    %c0_i32_0 = arith.constant 0 : i32
    %c0_i32_1 = arith.constant 0 : i32
    return %c0_i32, %c0_i32_0 : i32, i32
  }
  func.func @transform_1(%arg0: i32) -> (i32, i32) {
    %c0_i32 = arith.constant 0 : i32
    %c0_i32_0 = arith.constant 0 : i32
    %c0_i32_1 = arith.constant 0 : i32
    return %c0_i32, %c0_i32_0 : i32, i32
  }
  func.func @transform_2(%arg0: i32) -> (i32, i32) {
    %c0_i32 = arith.constant 0 : i32
    %c0_i32_0 = arith.constant 0 : i32
    %c0_i32_1 = arith.constant 0 : i32
    return %c0_i32, %c0_i32_0 : i32, i32
  }
  func.func @transform_3(%arg0: i32) -> (i32, i32) {
    %c0_i32 = arith.constant 0 : i32
    %c0_i32_0 = arith.constant 0 : i32
    %c0_i32_1 = arith.constant 0 : i32
    return %c0_i32, %c0_i32_0 : i32, i32
  }
  func.func @transform_4(%arg0: i32) -> (i32, i32) {
    %c0_i32 = arith.constant 0 : i32
    %c0_i32_0 = arith.constant 0 : i32
    %c0_i32_1 = arith.constant 0 : i32
    return %c0_i32, %c0_i32_0 : i32, i32
  }
  func.func @transform_5(%arg0: i32) -> (i32, i32) {
    %c0_i32 = arith.constant 0 : i32
    %c0_i32_0 = arith.constant 0 : i32
    %c0_i32_1 = arith.constant 0 : i32
    return %c0_i32, %c0_i32_0 : i32, i32
  }
  func.func @transform_6(%arg0: i32) -> (i32, i32) {
    %c0_i32 = arith.constant 0 : i32
    %c0_i32_0 = arith.constant 0 : i32
    %c0_i32_1 = arith.constant 0 : i32
    return %c0_i32, %c0_i32_0 : i32, i32
  }
  func.func @transform_7(%arg0: i32) -> (i32, i32) {
    %c0_i32 = arith.constant 0 : i32
    %c0_i32_0 = arith.constant 0 : i32
    %c0_i32_1 = arith.constant 0 : i32
    return %c0_i32, %c0_i32_0 : i32, i32
  }
  func.func @transform_8(%arg0: i32) -> (i32, i32) {
    %c0_i32 = arith.constant 0 : i32
    %c0_i32_0 = arith.constant 0 : i32
    %c0_i32_1 = arith.constant 0 : i32
    return %c0_i32, %c0_i32_0 : i32, i32
  }
  func.func @transform_9(%arg0: i32) -> (i32, i32, i32) {
    %c0_i32 = arith.constant 0 : i32
    %c0_i32_0 = arith.constant 0 : i32
    %c0_i32_1 = arith.constant 0 : i32
    return %arg0, %c0_i32, %c0_i32_0 : i32, i32, i32
  }
  func.func @transform_10(%arg0: i32) -> (i32, i32, i32) {
    %c0_i32 = arith.constant 0 : i32
    %c0_i32_0 = arith.constant 0 : i32
    %c0_i32_1 = arith.constant 0 : i32
    return %arg0, %c0_i32, %c0_i32_0 : i32, i32, i32
  }
  func.func @transform_11(%arg0: i32) -> (i32, i32, i32) {
    %c0_i32 = arith.constant 0 : i32
    %c0_i32_0 = arith.constant 0 : i32
    %c0_i32_1 = arith.constant 0 : i32
    return %arg0, %c0_i32, %c0_i32_0 : i32, i32, i32
  }
  func.func @transform_12(%arg0: i32) -> (i32, i32, i32) {
    %c0_i32 = arith.constant 0 : i32
    %c0_i32_0 = arith.constant 0 : i32
    %c0_i32_1 = arith.constant 0 : i32
    return %arg0, %c0_i32, %c0_i32_0 : i32, i32, i32
  }
  func.func @transform_13(%arg0: i32) -> (i32, i32, i32) {
    %c0_i32 = arith.constant 0 : i32
    %c0_i32_0 = arith.constant 0 : i32
    %c0_i32_1 = arith.constant 0 : i32
    return %arg0, %c0_i32, %c0_i32_0 : i32, i32, i32
  }
  func.func @transform_14(%arg0: i32) -> (i32, i32, i32) {
    %c0_i32 = arith.constant 0 : i32
    %c0_i32_0 = arith.constant 0 : i32
    %c0_i32_1 = arith.constant 0 : i32
    return %arg0, %c0_i32, %c0_i32_0 : i32, i32, i32
  }
  func.func @transform_15(%arg0: i32) -> (i32, i32, i32) {
    %c0_i32 = arith.constant 0 : i32
    %c0_i32_0 = arith.constant 0 : i32
    %c0_i32_1 = arith.constant 0 : i32
    return %arg0, %c0_i32, %c0_i32_0 : i32, i32, i32
  }
  func.func @transform_16(%arg0: i32) -> (i32, i32, i32) {
    %c0_i32 = arith.constant 0 : i32
    %c0_i32_0 = arith.constant 0 : i32
    %c0_i32_1 = arith.constant 0 : i32
    return %arg0, %c0_i32, %c0_i32_0 : i32, i32, i32
  }
  func.func @transform_17(%arg0: i32) -> (i32, i32, i32) {
    %c0_i32 = arith.constant 0 : i32
    %c0_i32_0 = arith.constant 0 : i32
    %c0_i32_1 = arith.constant 0 : i32
    return %arg0, %c0_i32, %c0_i32_0 : i32, i32, i32
  }
  func.func @transform_18(%arg0: i32) -> (i32, i32, i32) {
    %c0_i32 = arith.constant 0 : i32
    %c0_i32_0 = arith.constant 0 : i32
    %c0_i32_1 = arith.constant 0 : i32
    return %arg0, %c0_i32, %c0_i32_0 : i32, i32, i32
  }
  func.func @transform_19(%arg0: i32) -> (i32, i32) {
    %c0_i32 = arith.constant 0 : i32
    %c0_i32_0 = arith.constant 0 : i32
    %c0_i32_1 = arith.constant 0 : i32
    return %c0_i32, %c0_i32_0 : i32, i32
  }
  func.func @transform_20(%arg0: i32) -> (i32, i32) {
    %c0_i32 = arith.constant 0 : i32
    %c0_i32_0 = arith.constant 0 : i32
    %c0_i32_1 = arith.constant 0 : i32
    return %c0_i32, %c0_i32_0 : i32, i32
  }
  func.func @transform_21(%arg0: i32) -> (i32, i32) {
    %c0_i32 = arith.constant 0 : i32
    %c0_i32_0 = arith.constant 0 : i32
    %c0_i32_1 = arith.constant 0 : i32
    return %c0_i32, %c0_i32_0 : i32, i32
  }
  func.func @transform_22(%arg0: i32) -> (i32, i32) {
    %c0_i32 = arith.constant 0 : i32
    %c0_i32_0 = arith.constant 0 : i32
    %c0_i32_1 = arith.constant 0 : i32
    return %c0_i32, %c0_i32_0 : i32, i32
  }
  func.func @transform_23(%arg0: i32) -> (i32, i32) {
    %c0_i32 = arith.constant 0 : i32
    %c0_i32_0 = arith.constant 0 : i32
    %c0_i32_1 = arith.constant 0 : i32
    return %c0_i32, %c0_i32_0 : i32, i32
  }
}

</mosaic_0001>

<bundles_post_ra>
// kernel: tpu_custom_call.1
= control target key start
LH: loop header
LB: loop body
LE: loop exit
PB: predicated region body
PF: predicated region fallthrough
CT: control target
= control target key end

     0   :  { %s3707_s0 = inlined_call_operand.hbm [shape: f32[8,192], index: 0, kind: input, shape index: {}]   ;;  %s3708_s1 = inlined_call_operand.vmem [shape: f32[1,192], index: 1, kind: input, shape index: {}]   ;;  %s3709_s2 = inlined_call_operand.hbm [shape: f32[1,192], index: 2, kind: input, shape index: {}]   ;;  %s3710_s3 = inlined_call_operand.vmem [shape: bf16[192,64], index: 3, kind: input, shape index: {}]   ;;  %s3711_s4 = inlined_call_operand.hbm [shape: f32[1,64], index: 4, kind: input, shape index: {}]   ;;  %s3712_s5 = inlined_call_operand.hbm [shape: f32[1,64], index: 5, kind: input, shape index: {}]   ;;  %s3713_s6 = inlined_call_operand.hbm [shape: f32[1,64], index: 6, kind: input, shape index: {}]   ;;  %s3714_s7 = inlined_call_operand.vmem [shape: f32[4,64], index: 7, kind: input, shape index: {}]   ;;  %s3715_s8 = inlined_call_operand.vmem [shape: f32[4,64], index: 8, kind: input, shape index: {}]   ;;  %s3716_s9 = inlined_call_operand.vmem [shape: f32[2,1,64], index: 9, kind: input, shape index: {}]   ;;  %s3717_s10 = inlined_call_operand.vmem [shape: f32[2,1,64], index: 10, kind: input, shape index: {}]   ;;  %s3718_s11 = inlined_call_operand.vmem [shape: bf16[2,64,192], index: 11, kind: input, shape index: {}]   ;;  %s3719_s12 = inlined_call_operand.vmem [shape: bf16[2,64,64], index: 12, kind: input, shape index: {}]   ;;  %s3720_s13 = inlined_call_operand.vmem [shape: f32[2,1,64], index: 13, kind: input, shape index: {}]   ;;  %s3721_s14 = inlined_call_operand.vmem [shape: f32[2,1,64], index: 14, kind: input, shape index: {}]   ;;  %s3722_s15 = inlined_call_operand.vmem [shape: bf16[2,64,128], index: 15, kind: input, shape index: {}]   ;;  %s3723_s16 = inlined_call_operand.vmem [shape: f32[2,1,128], index: 16, kind: input, shape index: {}]   ;;  %s3724_s17 = inlined_call_operand.vmem [shape: bf16[2,128,64], index: 17, kind: input, shape index: {}]   ;;  %s3725_s18 = inlined_call_operand.vmem [shape: f32[2,1,64], index: 18, kind: input, shape index: {}]   ;;  %s3726_s19 = inlined_call_operand.vmem [shape: f32[1,64], index: 19, kind: input, shape index: {}]   ;;  %s3727_s20 = inlined_call_operand.vmem [shape: f32[1,64], index: 20, kind: input, shape index: {}]   ;;  %s3728_s21 = inlined_call_operand.vmem [shape: bf16[64,128], index: 21, kind: input, shape index: {}]   ;;  %s3729_s22 = inlined_call_operand.vmem [shape: f32[1,128], index: 22, kind: input, shape index: {}]   ;;  %s3730_s23 = inlined_call_operand.hbm [shape: f32[2,128], index: 23, kind: output, shape index: {}]  }
   0x1   :  { %3746 = sst [smem:[#allocation18_spill]] %s3707_s0 }
   0x2   :  { %3747 = sst [smem:[#allocation19_spill]] %s3708_s1 }
   0x3   :  { %3748 = sst [smem:[#allocation20_spill]] %s3709_s2 }
   0x4   :  { %3749 = sst [smem:[#allocation21_spill]] %s3710_s3 }
   0x5   :  { %3750 = sst [smem:[#allocation22_spill]] %s3711_s4 }
   0x6   :  { %3751 = sst [smem:[#allocation23_spill]] %s3712_s5 }
   0x7   :  { %3752 = sst [smem:[#allocation24_spill]] %s3713_s6 }
   0x8   :  { %3753 = sst [smem:[#allocation25_spill]] %s3714_s7 }
   0x9   :  { %3754 = sst [smem:[#allocation26_spill]] %s3718_s11 }
   0xa   :  { %3755 = sst [smem:[#allocation27_spill]] %s3719_s12 }
   0xb   :  { %3756 = sst [smem:[#allocation28_spill]] %s3726_s19 }
   0xc   :  { %3757 = sst [smem:[#allocation29_spill]] %s3727_s20 }
   0xd   :  { %3758 = sst [smem:[#allocation30_spill]] %s3729_s22 }
   0xe   :  { %3759 = sst [smem:[#allocation31_spill]] %s3730_s23 }
   0xf   :  { %28 = vsyncpa [#allocation4], 0 }
  0x10   :  { %29 = vsyncpa [#allocation7], 0 }
  0x11   :  { %30 = vsyncpa [#allocation10], 0 }
  0x12   :  { %31 = vsyncpa [#allocation5], 0  ;;  %s3206_s4 = smov 0  }
  0x13 LB: > { %3760 = sst [smem:[#allocation17_spill]] %s3068_s4  ;;  %s3070_s30 = smov [#allocation6]   ;;  %s3068_s4 = sphi %s3206_s4, %s37_s4  }
  0x14   : > { %s623_s24 = sshll.u32 %s3070_s30, 4  ;;  %s3212_s25 = sadd.s32 4294967295, %s3068_s4   ;;  %s3218_s24 = int_to_ptr.vmem [resolvable:$true] %s623_s24 }
  0x15   : > { %p2475_p0 = scmp.ge.s32.totalorder %s3068_s4, 1  ;;  %p596_p1 = scmp.lt.s32.totalorder %s3068_s4, 3 }
  0x16   : > { %p3741_p3 = scmp.eq.s32.totalorder %s3212_s25, 0  ;;  %s3071_s1 = smov [#allocation9]  }
  0x17   : > { %p3220_p4 = pnand %p2475_p0, %p596_p1  ;;  %s648_s26 = sshll.u32 %s3071_s1, 4  ;;  %s3226_s26 = int_to_ptr.vmem [resolvable:$true] %s648_s26 }
  0x18   : > { %s3072_s2 = smov [#allocation3]   ;;  %s3073_s7 = smov [#allocation8]  }
  0x19   : > { %s3761_s5 = scalar_select %p3220_p4, 1, 0 }
  0x1a   : > { %p2739_p5 = pneg %p3220_p4  ;;  %s609_s6 = sshll.u32 %s3072_s2, 4  ;;  %s3234_s6 = int_to_ptr.vmem [resolvable:$true] %s609_s6 }
  0x1b   : > { %s637_s28 = sshll.u32 %s3073_s7, 4  ;;  %s3763_s0 = sld [smem:[#allocation20_spill]]  ;;  %s3236_s28 = int_to_ptr.vmem [resolvable:$true] %s637_s28 }
  0x1c   : > { %p3230_p6 = pnand %p3741_p3, %p2739_p5 }
  0x1e   : > { %p3246_p8 = pneg %p3230_p6 }
  0x21   : > { %s2880_s30 = scalar_lea.hbm %s3763_s0, 32 }
  0x22   : > { %p2881_p7 = scmp.ne.s32.totalorder %s3763_s0, %s2880_s30  ;;  %p2887_p11 = scmp.lt.u32.totalorder %s2880_s30, %s3763_s0 }
  0x24   : > { %p2883_p9 = pnand %p3246_p8, %p2881_p7 }
  0x26   : > { %p2884_p10 = pneg %p2883_p9 }
  0x28   : > { %p2889_p12 = pnand %p2887_p11, %p2884_p10 }
  0x2a   : > { %2892 = shalt.err (!%p2889_p12)
}
  0x2b   : > { %s2893_s4 = scalar_lea.vmem %s3218_s24, 32  ;;  %p2901_p5 = scmp.lt.s32.totalorder %s3218_s24, %s3218_s24 }
  0x2c   : > { %p2894_p13 = scmp.ne.s32.totalorder %s3218_s24, %s2893_s4  ;;  %p2902_p2 = scmp.lt.s32.totalorder %s2893_s4, %s2893_s4 }
  0x2e   : > { %p2896_p0 = pnand %p2894_p13, %p3246_p8  ;;  %p2903_p7 = por %p2902_p2, %p2901_p5 }
  0x30   : > { %p2897_p1 = pneg %p2896_p0 }
  0x32   : > { %p2904_p9 = pnand %p2903_p7, %p2897_p1 }
  0x34   : > { %2907 = shalt.err (!%p2904_p9)
}
  0x35   : > { %2745 = dma.hbm_to_vmem [thread:$0]  (!%p3230_p6), %s3763_s0, 32, %s3218_s24, [#allocation7]  }
  0x36   : > { %s3765_s1 = sld [smem:[#allocation23_spill]] }
  0x3c   : > { %s2908_s7 = scalar_lea.hbm %s3765_s1, 16 }
  0x3d   : > { %p2909_p10 = scmp.ne.s32.totalorder %s3765_s1, %s2908_s7  ;;  %p2915_p12 = scmp.lt.u32.totalorder %s2908_s7, %s3765_s1 }
  0x3f   : > { %p2911_p2 = pnand %p2909_p10, %p3246_p8 }
  0x41   : > { %p2912_p11 = pneg %p2911_p2 }
  0x43   : > { %p2917_p13 = pnand %p2915_p12, %p2912_p11 }
  0x45   : > { %2920 = shalt.err (!%p2917_p13)
}
  0x46   : > { %s2921_s24 = scalar_lea.vmem %s3226_s26, 16  ;;  %s2928_s20 = scalar_lea.vmem %s3226_s26, 32 }
  0x47   : > { %p2922_p0 = scmp.ne.s32.totalorder %s3226_s26, %s2921_s24  ;;  %p2929_p7 = scmp.lt.s32.totalorder %s3226_s26, %s3226_s26 }
  0x48   : > { %p2930_p9 = scmp.lt.s32.totalorder %s2928_s20, %s2921_s24 }
  0x49   : > { %p2924_p1 = pnand %p2922_p0, %p3246_p8 }
  0x4a   : > { %p2931_p10 = por %p2930_p9, %p2929_p7 }
  0x4b   : > { %p2925_p5 = pneg %p2924_p1 }
  0x4d   : > { %p2932_p2 = pnand %p2931_p10, %p2925_p5 }
  0x4f   : > { %2935 = shalt.err (!%p2932_p2)
}
  0x50   : > { %2751 = dma.hbm_to_vmem [thread:$0]  (!%p3230_p6), %s3765_s1, 16, %s3226_s26, [#allocation10]  }
  0x51   : > { %s3766_s3 = sld [smem:[#allocation18_spill]] }
  0x57   : > { %s2936_s30 = scalar_lea.hbm %s3766_s3, 256 }
  0x58   : > { %p2937_p11 = scmp.ne.s32.totalorder %s3766_s3, %s2936_s30  ;;  %p2943_p0 = scmp.lt.u32.totalorder %s2936_s30, %s3766_s3 }
  0x5a   : > { %p2939_p12 = pnand %p2937_p11, %p3246_p8 }
  0x5c   : > { %p2940_p13 = pneg %p2939_p12 }
  0x5e   : > { %p2945_p1 = pnand %p2943_p0, %p2940_p13 }
  0x60   : > { %2948 = shalt.err (!%p2945_p1)
}
  0x61   : > { %s2949_s26 = scalar_lea.vmem %s3234_s6, 256  ;;  %p2957_p10 = scmp.lt.s32.totalorder %s3234_s6, %s3234_s6 }
  0x62   : > { %p2950_p5 = scmp.ne.s32.totalorder %s3234_s6, %s2949_s26  ;;  %p2958_p2 = scmp.lt.s32.totalorder %s2949_s26, %s2949_s26 }
  0x64   : > { %p2952_p7 = pnand %p2950_p5, %p3246_p8  ;;  %p2959_p11 = por %p2958_p2, %p2957_p10 }
  0x66   : > { %p2953_p9 = pneg %p2952_p7 }
  0x68   : > { %p2960_p12 = pnand %p2959_p11, %p2953_p9 }
  0x6a   : > { %2963 = shalt.err (!%p2960_p12)
}
  0x6b   : > { %2742 = dma.hbm_to_vmem [thread:$0]  (!%p3230_p6), %s3766_s3, 256, %s3234_s6, [#allocation4]  }
  0x6c   : > { %s3767_s30 = sld [smem:[#allocation22_spill]] }
  0x72   : > { %s2964_s7 = scalar_lea.hbm %s3767_s30, 16 }
  0x73   : > { %p2965_p13 = scmp.ne.s32.totalorder %s3767_s30, %s2964_s7  ;;  %p2971_p5 = scmp.lt.u32.totalorder %s2964_s7, %s3767_s30 }
  0x75   : > { %p2967_p0 = pnand %p2965_p13, %p3246_p8 }
  0x77   : > { %p2968_p1 = pneg %p2967_p0 }
  0x79   : > { %p2973_p7 = pnand %p2971_p5, %p2968_p1 }
  0x7b   : > { %2976 = shalt.err (!%p2973_p7)
}
  0x7c   : > { %s2977_s6 = scalar_lea.vmem %s3236_s28, 16  ;;  %s2984_s19 = scalar_lea.vmem %s3236_s28, 32 }
  0x7d   : > { %p2978_p9 = scmp.ne.s32.totalorder %s3236_s28, %s2977_s6  ;;  %p2985_p11 = scmp.lt.s32.totalorder %s3236_s28, %s3236_s28 }
  0x7e   : > { %p2986_p12 = scmp.lt.s32.totalorder %s2984_s19, %s2977_s6 }
  0x7f   : > { %p2980_p10 = pnand %p2978_p9, %p3246_p8 }
  0x80   : > { %p2987_p13 = por %p2986_p12, %p2985_p11 }
  0x81   : > { %p2981_p2 = pneg %p2980_p10 }
  0x83   : > { %p2988_p0 = pnand %p2987_p13, %p2981_p2 }
  0x85   : > { %2991 = shalt.err (!%p2988_p0)
}
  0x86   : > { %2748 = dma.hbm_to_vmem [thread:$0]  (!%p3230_p6), %s3767_s30, 16, %s3236_s28, [#allocation7]  }
  0x87   : > { %s3074_s29 = smov [#allocation11]   ;;  %s3768_s20 = sld [smem:[#allocation24_spill]] }
  0x88   : > { %s659_s7 = sshll.u32 %s3074_s29, 4  ;;  %s660_s7 = int_to_ptr.vmem [resolvable:$true] %s659_s7 }
  0x8d   : > { %s2992_s26 = scalar_lea.hbm %s3768_s20, 16 }
  0x8e   : > { %p2993_p1 = scmp.ne.s32.totalorder %s3768_s20, %s2992_s26  ;;  %p2999_p9 = scmp.lt.u32.totalorder %s2992_s26, %s3768_s20 }
  0x90   : > { %p2995_p5 = pnand %p2993_p1, %p3246_p8 }
  0x92   : > { %p2996_p7 = pneg %p2995_p5 }
  0x94   : > { %p3001_p10 = pnand %p2999_p9, %p2996_p7 }
  0x96   : > { %3004 = shalt.err (!%p3001_p10)
}
  0x97   : > { %s3005_s28 = scalar_lea.vmem %s660_s7, 16  ;;  %s3012_s22 = scalar_lea.vmem %s660_s7, 32 }
  0x98   : > { %p3006_p2 = scmp.ne.s32.totalorder %s660_s7, %s3005_s28  ;;  %p3013_p13 = scmp.lt.s32.totalorder %s660_s7, %s660_s7 }
  0x99   : > { %p3014_p0 = scmp.lt.s32.totalorder %s3012_s22, %s3005_s28 }
  0x9a   : > { %p3008_p11 = pnand %p3006_p2, %p3246_p8 }
  0x9b   : > { %p3015_p3 = por %p3014_p0, %p3013_p13 }
  0x9c   : > { %p3009_p12 = pneg %p3008_p11 }
  0x9e   : > { %p3016_p4 = pnand %p3015_p3, %p3009_p12 }
  0xa0   : > { %3019 = shalt.err (!%p3016_p4)
}
  0xa1   : > { %2754 = dma.hbm_to_vmem [thread:$0]  (!%p3230_p6), %s3768_s20, 16, %s660_s7, [#allocation10]  }
  0xa2   : > { %p3769_p1 = scmp.ne.s32.totalorder %s3761_s5, 0 }
  0xa3   : > { %p3770_p5 = scmp.eq.s32.totalorder (!%p3769_p1), %s3212_s25, 0 }
  0xa4   : > { %758 = sbr.rel (%p3769_p1) target bundleno = 4706 (0x1262), region = 112 }
  0xab   : > { %3051 = dma.done.wait (%p3770_p5), [#allocation4], 256   ;;  %p3771_p8 = pmov %p3770_p5 }
  0xac   : > { %p3772_p7 = pmov %p3770_p5 }
  0xad   : > { %3053 = vsyncadd (%p3771_p8), [#allocation4], 4294967040 }
  0xae   : > { %3055 = dma.done.wait (%p3772_p7), [#allocation7], 48   ;;  %p3773_p3 = pmov %p3770_p5 }
  0xb0   : > { %3057 = vsyncadd (%p3773_p3), [#allocation7], 4294967248  ;;  %p3774_p4 = pmov %p3773_p3 }
  0xb1   : > { %p3775_p6 = pmov %p3773_p3 }
  0xb2   : > { %3059 = dma.done.wait (%p3774_p4), [#allocation10], 32  }
  0xb3   : > { %3061 = vsyncadd (%p3775_p6), [#allocation10], 4294967264  ;;  %p866_p9 = scmp.lt.s32.totalorder %s3212_s25, 1  ;;  %s3776_s11 = sld [smem:[#allocation26_spill]] }
  0xb4   : > { %s3777_s12 = sld [smem:[#allocation27_spill]]  ;;  %p3778_p10 = scmp.ne.s32.totalorder %s3212_s25, 0 }
  0xb5   : > { %s3372_s5 = scalar_select %p866_p9, %s3212_s25, 1 }
  0xb6   : > { %908 = sbr.rel (%p3778_p10) target bundleno = 1036 (0x40c), region = 136  ;;  %v909_v0 = vld [vmem:[#allocation3] sm:$0xff] (!%p3778_p10)  ;;  %v910_v1 = vld [vmem:[#allocation3 + $0x8] sm:$0xff] (!%p3778_p10)  ;;  %vm913_vm0 = vcmask (!%p3778_p10), 523264   ;;  %s3779_s4 = sld [smem:[#allocation21_spill]] (!%p3778_p10)  ;;  %v3075_v5 = vmov (!%p3778_p10), 0   ;;  %v934_v27 = vlaneseq (!%p3778_p10) }
  0xb7   : > { %s2567_s24 = sshll.u32 %s3372_s5, 6  ;;  %s2568_s26 = sshll.u32 %s3372_s5, 5  ;;  %v914_v2 = vsel (!%p3778_p10), %vm913_vm0, %v910_v1, 0.0  ;;  %1067 = vmatprep.subr.bf16.mxu0 (!%p3778_p10), %v3075_v5  ;;  %v912_v33 = vld [vmem:[#allocation6] sm:$0x3] (!%p3778_p10)  ;;  %vm1147_vm1 = vcmask (!%p3778_p10), 1043456  }
  0xb8   : > { %s887_s29 = scalar_lea.vmem %s3721_s14, %s3372_s5  ;;  %s3405_s30 = scalar_lea.vmem %s3722_s15, %s2568_s26  ;;  %v915_v3 = vadd.f32 (!%p3778_p10), %v914_v2, %v909_v0  ;;  %v935_v29 = vshrl.u32 (!%p3778_p10), %v934_v27, 7  ;;  %v2497_v47 = vld [vmem:[#allocation8] ss:$0 sm:$0xff] (!%p3778_p10)  ;;  %v2511_v63 = vld [vmem:[#allocation9] ss:$0 sm:$0xff] (!%p3778_p10) }
  0xb9   : > { %s3387_s28 = scalar_lea.vmem %s3776_s11, %s2567_s24  ;;  %s895_s11 = scalar_lea.vmem %s3723_s16, %s3372_s5  ;;  %v1143_v2 = vld [vmem:[%s3715_s8] sm:$0xf] (!%p3778_p10) }
  0xba   : > { %s3392_s23 = scalar_lea.vmem %s3777_s12, %s2568_s26  ;;  %s3414_s12 = scalar_lea.vmem %s3724_s17, %s2567_s24  ;;  %916 = vadd.xlane.f32.xlu0 (!%p3778_p10), %v915_v3  ;;  %v936_v30 = vsub.s32 (!%p3778_p10), 0, %v935_v29  ;;  %v940_v31 = vsub.s32 (!%p3778_p10), 1, %v935_v29 }
  0xbb   : > { %s903_s1 = scalar_lea.vmem %s3725_s18, %s3372_s5  ;;  %s3781_s6 = sld [smem:[#allocation19_spill]] (!%p3778_p10) }
  0xbc   : > { %s3780_s26 = smov (!%p3778_p10), %s3779_s4  ;;  %v2791_v4 = vld [vmem:[%s3779_s4] sm:$0xff] (!%p3778_p10)   ;;  %v950_v38 = vrot.slane (!%p3778_p10), %v912_v33, %v936_v30  ;;  %v954_v39 = vrot.slane (!%p3778_p10), %v912_v33, %v940_v31  ;;  %s3782_s2 = sld [smem:[#allocation25_spill]] (!%p3778_p10) }
  0xbd   : > { %1068 = vmatpush1.bf16.msra.mxu0 %v2791_v4  ;;  %v2792_v6 = vld [vmem:[%s3780_s26 + $0x8] sm:$0xff]   ;;  %v2793_v7 = vld [vmem:[%s3780_s26 + $0x10] sm:$0xff]   ;;  %v2794_v8 = vld [vmem:[%s3780_s26 + $0x18] sm:$0xff]  }
  0xbe   : > { %1069 = vmatprep.subr.bf16.mxu0 %v3075_v5  ;;  %v2795_v9 = vld [vmem:[%s3780_s26 + $0x20] sm:$0xff]   ;;  %v2796_v10 = vld [vmem:[%s3780_s26 + $0x28] sm:$0xff]   ;;  %v2797_v19 = vld [vmem:[%s3780_s26 + $0x30] sm:$0xff]  }
  0xbf   : > { %v2798_v20 = vld [vmem:[%s3780_s26 + $0x38] sm:$0xff]   ;;  %v2799_v21 = vld [vmem:[%s3780_s26 + $0x40] sm:$0xff]   ;;  %v2800_v22 = vld [vmem:[%s3780_s26 + $0x48] sm:$0xff]  }
  0xc0   : > { %v2801_v23 = vld [vmem:[%s3780_s26 + $0x50] sm:$0xff]   ;;  %v2802_v24 = vld [vmem:[%s3780_s26 + $0x58] sm:$0xff]  }
  0xc1   : > { %1070 = vmatpush1.bf16.msra.mxu0 %v2792_v6  ;;  %v911_v32 = vld [vmem:[%s3781_s6] sm:$0x3] }
  0xc2   : > { %1071 = vmatprep.subr.bf16.mxu0 %v3075_v5  ;;  %v937_v34 = vrot.slane %v911_v32, %v936_v30  ;;  %v941_v35 = vrot.slane %v911_v32, %v940_v31  ;;  %v1140_v4 = vld [vmem:[%s3782_s2] sm:$0xf] }
  0xc5   : > { %1072 = vmatpush1.bf16.msra.mxu0 %v2793_v7 }
  0xc6   : > { %1073 = vmatprep.subr.bf16.mxu0 %v3075_v5 }
  0xc9   : > { %1074 = vmatpush1.bf16.msra.mxu0 %v2794_v8 }
  0xca   : > { %1075 = vmatprep.subr.bf16.mxu0 %v3075_v5 }
  0xcd   : > { %1076 = vmatpush1.bf16.msra.mxu0 %v2795_v9 }
  0xce   : > { %1077 = vmatprep.subr.bf16.mxu0 %v3075_v5 }
  0xd1   : > { %1078 = vmatpush1.bf16.msra.mxu0 %v2796_v10 }
  0xd2   : > { %1079 = vmatprep.subr.bf16.mxu0 %v3075_v5 }
  0xd5   : > { %1080 = vmatpush1.bf16.msra.mxu0 %v2797_v19 }
  0xd6   : > { %1081 = vmatprep.subr.bf16.mxu0 %v3075_v5 }
  0xd9   : > { %1082 = vmatpush1.bf16.msra.mxu0 %v2798_v20 }
  0xda   : > { %1083 = vmatprep.subr.bf16.mxu0 %v3075_v5 }
  0xdd   : > { %1084 = vmatpush1.bf16.msra.mxu0 %v2799_v21 }
  0xde   : > { %1085 = vmatprep.subr.bf16.mxu0 %v3075_v5 }
  0xe1   : > { %1086 = vmatpush1.bf16.msra.mxu0 %v2800_v22 }
  0xe2   : > { %1087 = vmatprep.subr.bf16.mxu0 %v3075_v5 }
  0xe5   : > { %1088 = vmatpush1.bf16.msra.mxu0 %v2801_v23 }
  0xe6   : > { %1089 = vmatprep.subr.bf16.mxu0 %v3075_v5  ;;  %v1145_v5 = vrot.slane %v1143_v2, 4 }
  0xe9   : > { %1090 = vmatpush1.bf16.msra.mxu0 %v2802_v24 }
 0x147   : > { %v917_v11 = vpop.xlane.xlu0 %916 }
 0x148   : > { %v919_v12 = vmul.f32 0.0052083335, %v917_v11 }
 0x14a   : > { %v920_v13 = vsub.f32 %v909_v0, %v919_v12  ;;  %v921_v14 = vsub.f32 %v910_v1, %v919_v12  ;;  %v2512_v1 = vld [vmem:[#allocation11] ss:$0 sm:$0xff] }
 0x14c   : > { %v922_v15 = vmul.f32 %v920_v13, %v920_v13  ;;  %v923_v16 = vmul.f32 %v921_v14, %v921_v14 }
 0x14e   : > { %v924_v17 = vsel %vm913_vm0, %v923_v16, 0.0 }
 0x14f   : > { %v925_v18 = vadd.f32 %v924_v17, %v922_v15 }
 0x151   : > { %926 = vadd.xlane.f32.xlu0 %v925_v18 }
 0x1de   : > { %v927_v25 = vpop.xlane.xlu0 %926 }
 0x1df   : > { %v928_v26 = vmul.f32 0.0052083335, %v927_v25 }
 0x1e1   : > { %v929_v28 = vadd.f32 1e-05, %v928_v26 }
 0x1e3   : > { %2803 = vrsqrt.f32 %v929_v28 }
 0x1ed   : > { %v2804_v36 = vpop.eup %2803 }
 0x1ee   : > { %v932_v37 = vmul.f32 %v2804_v36, %v921_v14  ;;  %v931_v40 = vmul.f32 %v2804_v36, %v920_v13 }
 0x1f0   : > { %v945_v41 = vmul.f32 %v941_v35, %v932_v37  ;;  %v944_v42 = vmul.f32 %v937_v34, %v931_v40 }
 0x1f2   : > { %v958_v43 = vadd.f32 %v954_v39, %v945_v41  ;;  %v957_v44 = vadd.f32 %v950_v38, %v944_v42 }
 0x1f4   : > { %v960_v45 = vpack.c.bf16 %v958_v43, %v958_v43  ;;  %v959_v46 = vpack.c.bf16 %v957_v44, %v957_v44 }
 0x1f6   : > { %2510 = vmatprep.mubr.msk.bf16.mxu0 %vm913_vm0, %v960_v45 }
 0x1f7   : > { %1100 = vmatmul.mubr.bf16.vlgmr.msra.gmra.mrb[0].mxu0 %v959_v46 }
 0x2ca   : > { %v1101_v48 = vpop.f32.mrb[0].mxu0 }
 0x2cb   : > { %v1102_v49 = vadd.f32 %v2497_v47, %v1101_v48  ;;  %v1103_v50 = vpop.f32.mrb[1].mxu0 }
 0x2cc   : > { %v1104_v51 = vpop.f32.mrb[2].mxu0 }
 0x2cd   : > { %v1105_v52 = vpop.f32.mrb[3].mxu0  ;;  %v1109_v53 = vsel %vm913_vm0, %v1102_v49, 0.0 }
 0x2ce   : > { %1110 = vadd.xlane.f32.xlu1 %v1109_v53 }
 0x35b   : > { %v1111_v54 = vpop.xlane.xlu1 %1110 }
 0x35c   : > { %v1113_v55 = vmul.f32 0.015625, %v1111_v54 }
 0x35e   : > { %v1114_v56 = vsub.f32 %v1102_v49, %v1113_v55 }
 0x360   : > { %v1115_v57 = vmul.f32 %v1114_v56, %v1114_v56 }
 0x362   : > { %v1116_v58 = vsel %vm913_vm0, %v1115_v57, 0.0 }
 0x363   : > { %1117 = vadd.xlane.f32.xlu1 %v1116_v58 }
 0x3f0   : > { %v1118_v59 = vpop.xlane.xlu1 %1117 }
 0x3f1   : > { %v1119_v60 = vmul.f32 0.015625, %v1118_v59 }
 0x3f3   : > { %v1120_v61 = vadd.f32 1e-05, %v1119_v60 }
 0x3f5   : > { %2805 = vrsqrt.f32 %v1120_v61 }
 0x3ff   : > { %v2806_v62 = vpop.eup %2805 }
 0x400   : > { %v1122_v0 = vmul.f32 %v2806_v62, %v1114_v56 }
 0x402   : > { %v1129_v3 = vmul.f32 %v2511_v63, %v1122_v0 }
 0x404   : > { %v1136_v6 = vadd.f32 %v2512_v1, %v1129_v3 }
 0x406   : > { %v1138_v7 = vcombine.high %v1136_v6, %v1136_v6  ;;  %v1141_v8 = vadd.f32 %v1140_v4, %v1136_v6 }
 0x408   : > { %v1142_v9 = vadd.f32 %v1140_v4, %v1138_v7  ;;  %v1148_v10 = vsel %vm1147_vm1, %v1141_v8, %v1145_v5 }
 0x409   : > { %1150 = vst.msk [vmem:[#allocation2] sm:$0xff] %vm913_vm0, %v1148_v10 }
 0x40a   : > { %v1149_v11 = vsel %vm1147_vm1, %v1142_v9, %v1145_v5 }
 0x40b   : > { %1151 = vst.msk [vmem:[#allocation2 + $0x8] sm:$0xff] %vm913_vm0, %v1149_v11 }
 0x40c PF: > { %vm1156_vm2 = vcmask 523264   ;;  %v2812_v26 = vld [vmem:[%s3387_s28 + $0x4] ss:$8 sps:$4 sm:$0xff]   ;;  %v2814_v27 = vld [vmem:[%s3387_s28] ss:$8 sps:$4 sm:$0xff]   ;;  %v3076_v34 = vmov 0   ;;  %s3783_s4 = scalar_lea.vmem %s3716_s9, %s3372_s5  ;;  %s3784_s7 = scalar_lea.vmem %s3717_s10, %s3372_s5 }
 0x40d   : > { %1252 = vmatprep.subr.bf16.mxu1 %v2812_v26  ;;  %v2815_v28 = vld [vmem:[%s3387_s28 + $0x14] ss:$8 sps:$4 sm:$0xff]   ;;  %v2817_v29 = vld [vmem:[%s3387_s28 + $0x10] ss:$8 sps:$4 sm:$0xff]   ;;  %v2818_v30 = vld [vmem:[%s3387_s28 + $0x24] ss:$8 sps:$4 sm:$0xff]   ;;  %1284 = vmatprep.mubr.bf16.mxu1 %v3076_v34 }
 0x40e   : > { %1253 = vmatpush1.bf16.msra.mxu1 %v2814_v27  ;;  %v2820_v31 = vld [vmem:[%s3387_s28 + $0x20] ss:$8 sps:$4 sm:$0xff]   ;;  %v2821_v32 = vld [vmem:[%s3387_s28 + $0x34] ss:$8 sps:$4 sm:$0xff]   ;;  %v2823_v33 = vld [vmem:[%s3387_s28 + $0x30] ss:$8 sps:$4 sm:$0xff]  }
 0x40f   : > { %1254 = vmatprep.subr.bf16.mxu1 %v2815_v28  ;;  %v2513_v43 = vld [vmem:[%s3783_s4] ss:$0 sm:$0xff]  ;;  %v3077_v52 = vmov 0.0   ;;  %vm3078_vm3 = vmmov 0   ;;  %vm1428_vm4 = vcmask 1043456   ;;  %s3079_s6 = smov 64  }
 0x410   : > { %v3474_v12 = vld [vmem:[#allocation2] sm:$0xff]  ;;  %2623 = vmatprep.subr.bf16.mxu0 %v3077_v52  ;;  %2625 = vmatprep.mubr.msk.bf16.mxu0 %vm3078_vm3, %v3077_v52  ;;  %vm1302_vm5 = vcmask 261120   ;;  %vm1400_vm6 = vcmask 64512   ;;  %s3080_s19 = smov 32   ;;  %s3081_s22 = smov 96  }
 0x411   : > { %v1157_v14 = vsel %vm1156_vm2, %v3474_v12, 0.0  ;;  %v2514_v47 = vld [vmem:[%s3784_s7] ss:$0 sm:$0xff]  ;;  %p2554_p2 = scmp.ne.s32.totalorder %s3212_s25, 1 }
 0x412   : > { %v3476_v13 = vld [vmem:[#allocation2 + $0x8] sm:$0xff]  ;;  %1158 = vadd.xlane.f32.xlu0 %v1157_v14  ;;  %1255 = vmatpush1.bf16.msra.mxu1 %v2817_v29  ;;  %vm3084_vm9 = vmmov (!%p2554_p2), 0   ;;  %s3787_s27 = sld [smem:[#allocation29_spill]] (!%p2554_p2)  ;;  %vm2178_vm10 = vcmask (!%p2554_p2), 519168   ;;  %vm2217_vm11 = vcmask (!%p2554_p2), 1041409   ;;  %s3788_s3 = sld [smem:[#allocation30_spill]] (!%p2554_p2) }
 0x413   : > { %v1160_v15 = vsel %vm1156_vm2, %v3476_v13, 0.0  ;;  %1256 = vmatprep.subr.bf16.mxu1 %v2818_v30 }
 0x416   : > { %1161 = vadd.xlane.f32.xlu0 %v1160_v15  ;;  %1257 = vmatpush1.bf16.msra.mxu1 %v2820_v31 }
 0x417   : > { %1258 = vmatprep.subr.bf16.mxu1 %v2821_v32 }
 0x41a   : > { %1259 = vmatpush1.bf16.msra.mxu1 %v2823_v33 }
 0x41b   : > { %2611 = vmatprep.subr.bf16.mxu1 %v3077_v52 }
 0x49f   : > { %v1159_v16 = vpop.xlane.xlu0 %1158 }
 0x4a0   : > { %v1164_v17 = vmul.f32 0.015625, %v1159_v16 }
 0x4a2   : > { %v1166_v18 = vsub.f32 %v3474_v12, %v1164_v17 }
 0x4a3   : > { %v1162_v19 = vpop.xlane.xlu0 %1161 }
 0x4a4   : > { %v1165_v20 = vmul.f32 0.015625, %v1162_v19  ;;  %v1168_v21 = vmul.f32 %v1166_v18, %v1166_v18 }
 0x4a6   : > { %v1167_v22 = vsub.f32 %v3476_v13, %v1165_v20  ;;  %v1170_v23 = vsel %vm1156_vm2, %v1168_v21, 0.0 }
 0x4a7   : > { %1171 = vadd.xlane.f32.xlu1 %v1170_v23 }
 0x4a8   : > { %v1169_v24 = vmul.f32 %v1167_v22, %v1167_v22 }
 0x4aa   : > { %v1173_v25 = vsel %vm1156_vm2, %v1169_v24, 0.0 }
 0x4ab   : > { %1174 = vadd.xlane.f32.xlu1 %v1173_v25 }
 0x534   : > { %v1172_v35 = vpop.xlane.xlu1 %1171 }
 0x535   : > { %v1176_v36 = vmul.f32 0.015625, %v1172_v35 }
 0x537   : > { %v1178_v37 = vadd.f32 1e-05, %v1176_v36 }
 0x538   : > { %v1175_v38 = vpop.xlane.xlu1 %1174 }
 0x539   : > { %2840 = vrsqrt.f32 %v1178_v37  ;;  %v1177_v39 = vmul.f32 0.015625, %v1175_v38 }
 0x53b   : > { %v1179_v40 = vadd.f32 1e-05, %v1177_v39 }
 0x53d   : > { %2842 = vrsqrt.f32 %v1179_v40 }
 0x543   : > { %v2841_v41 = vpop.eup %2840 }
 0x544   : > { %v1182_v42 = vmul.f32 %v2841_v41, %v1166_v18 }
 0x546   : > { %v1190_v46 = vmul.f32 %v2513_v43, %v1182_v42 }
 0x547   : > { %v2843_v44 = vpop.eup %2842 }
 0x548   : > { %v1183_v45 = vmul.f32 %v2843_v44, %v1167_v22  ;;  %v1198_v49 = vadd.f32 %v2514_v47, %v1190_v46 }
 0x54a   : > { %v1191_v48 = vmul.f32 %v2513_v43, %v1183_v45 }
 0x54c   : > { %v1199_v50 = vadd.f32 %v2514_v47, %v1191_v48 }
 0x54e   : > { %v1200_v51 = vpack.c.bf16 %v1199_v50, %v1198_v49 }
 0x550   : > { %2523 = vmatmul.mubr.msk.bf16.vlgmr.msra.gmra.mrb[0].mxu1 %vm1156_vm2, %v1200_v51 }
 0x551   : > { %2613 = vmatprep.mubr.msk.bf16.mxu1 %vm3078_vm3, %v3077_v52 }
 0x623   : > { %v1286_v53 = vpop.f32.mrb[0].mxu1 }
 0x624   : > { %v1295_v54 = vpack.c.bf16 %v1286_v53, %v1286_v53  ;;  %v1288_v55 = vpop.f32.mrb[1].mxu1 }
 0x625   : > { %v3511_v56 = vpack.c.bf16 %v1288_v55, %v1288_v55  ;;  %v1290_v57 = vpop.f32.mrb[2].mxu1 }
 0x626   : > { %v1296_v58 = vpack.c.bf16 %v1290_v57, %v1290_v57  ;;  %1300 = vrot.lane.b32.xlu0 %v1295_v54, %s3079_s6  ;;  %v1292_v59 = vpop.f32.mrb[3].mxu1 }
 0x627   : > { %v1430_v60 = vsel %vm1428_vm4, %v3511_v56, 0  ;;  %v3523_v1 = vpack.c.bf16 %v1292_v59, %v1292_v59 }
 0x628   : > { %2624 = vmatpush3.bf16.msra.mxu0 %v1430_v60  ;;  %1350 = vrot.lane.b32.xlu1 %v1296_v58, %s3079_s6 }
 0x629   : > { %2635 = vmatprep.subr.bf16.mxu0 %v3077_v52  ;;  %v1476_v2 = vsel %vm1428_vm4, %v3523_v1, 0 }
 0x698   : > { %v1301_v61 = vpop.permute.xlu0 %1300 }
 0x699   : > { %v1307_v62 = vsel %vm1302_vm5, %v1301_v61, 0 }
 0x69a   : > { %2612 = vmatpush3.bf16.xpose.msra.mxu1 %v1307_v62  ;;  %v1351_v63 = vpop.permute.xlu1 %1350 }
 0x69b   : > { %2617 = vmatprep.subr.bf16.mxu1 %v3077_v52  ;;  %v1356_v0 = vsel %vm1302_vm5, %v1351_v63, 0 }
 0x6a1   : > { %2614 = vmatmul.mubr.msk.bf16.vlgmr.msra.gmra.mrb[4].mxu1 %vm1302_vm5, %v1295_v54 }
 0x6a2   : > { %2618 = vmatpush3.bf16.xpose.msra.mxu1 %v1356_v0  ;;  %2619 = vmatprep.mubr.msk.bf16.mxu1 %vm3078_vm3, %v3077_v52 }
 0x6a3   : > { %2629 = vmatprep.subr.bf16.mxu1 %v3077_v52 }
 0x6a9   : > { %2620 = vmatmul.mubr.msk.bf16.vlgmr.msra.gmra.mrb[8].mxu1 %vm1302_vm5, %v1296_v58 }
 0x6aa   : > { %2630 = vmatpush3.bf16.msra.mxu1 %v1476_v2  ;;  %2631 = vmatprep.mubr.msk.bf16.mxu1 %vm3078_vm3, %v3077_v52 }
 0x6ab   : > { %2641 = vmatprep.subr.bf16.mxu1 %v3077_v52 }
 0x774   : > { %v1343_v3 = vpop.f32.mrb[4].mxu1 }
 0x775   : > { %v1398_v4 = vmul.f32 0.17677669, %v1343_v3  ;;  %v2615_v5 = vpop.f32.mrb[5].mxu1 }
 0x776   : > { %v1346_v6 = vpop.f32.mrb[6].mxu1 }
 0x777   : > { %v2616_v7 = vpop.f32.mrb[7].mxu1  ;;  %v1401_v8 = vsel %vm1400_vm6, %v1398_v4, -inf }
 0x778   : > { %1402 = vmax.xlane.f32.xlu1 %v1401_v8 }
 0x77c   : > { %v1392_v9 = vpop.f32.mrb[8].mxu1 }
 0x77d   : > { %v1399_v10 = vmul.f32 0.17677669, %v1392_v9  ;;  %v2621_v11 = vpop.f32.mrb[9].mxu1 }
 0x77e   : > { %v1395_v14 = vpop.f32.mrb[10].mxu1 }
 0x77f   : > { %v2622_v15 = vpop.f32.mrb[11].mxu1  ;;  %v1404_v16 = vsel %vm1400_vm6, %v1399_v10, -inf }
 0x780   : > { %1405 = vmax.xlane.f32.xlu0 %v1404_v16 }
 0x789   : > { %1570 = vrot.lane.b32.xlu1 %v1296_v58, %s3080_s19 }
 0x805   : > { %v1403_v17 = vpop.xlane.xlu1 %1402 }
 0x806   : > { %v1407_v18 = vsub.f32 %v1398_v4, %v1403_v17 }
 0x808   : > { %v1409_v19 = vmul.f32 1.442695, %v1407_v18 }
 0x809   : > { %v1571_v28 = vpop.permute.xlu1 %1570 }
 0x80a   : > { %2844 = vpow2.f32 %v1409_v19  ;;  %v1576_v39 = vsel %vm1302_vm5, %v1571_v28, 0 }
 0x80d   : > { %v1406_v20 = vpop.xlane.xlu0 %1405 }
 0x80e   : > { %v1408_v21 = vsub.f32 %v1399_v10, %v1406_v20 }
 0x810   : > { %v1411_v22 = vmul.f32 1.442695, %v1408_v21 }
 0x812   : > { %2846 = vpow2.f32 %v1411_v22  ;;  %v2824_v22 = vld [vmem:[%s3392_s23] sm:$0xff]  }
 0x814   : > { %v2845_v23 = vpop.eup %2844 }
 0x815   : > { %v1413_v24 = vsel %vm1400_vm6, %v2845_v23, 0.0 }
 0x816   : > { %1414 = vadd.xlane.f32.xlu0 %v1413_v24  ;;  %v2826_v24 = vld [vmem:[%s3392_s23 + $0x10] sm:$0xff]  }
 0x81c   : > { %v2847_v25 = vpop.eup %2846 }
 0x81d   : > { %v1416_v26 = vsel %vm1400_vm6, %v2847_v25, 0.0 }
 0x81e   : > { %1417 = vadd.xlane.f32.xlu1 %v1416_v26 }
 0x82c   : > { %1520 = vrot.lane.b32.xlu0 %v1295_v54, %s3080_s19 }
 0x82f   : > { %1518 = vrot.lane.b32.xlu1 %v1295_v54, %s3081_s22 }
 0x833   : > { %1568 = vrot.lane.b32.xlu1 %v1296_v58, %s3081_s22 }
 0x8a3   : > { %v1415_v27 = vpop.xlane.xlu0 %1414 }
 0x8a4   : > { %2848 = vrcp.f32 %v1415_v27 }
 0x8a7   : > { %v1521_v32 = vpop.permute.xlu0 %1520 }
 0x8a8   : > { %v1526_v34 = vsel %vm1302_vm5, %v1521_v32, 0 }
 0x8ab   : > { %v1418_v29 = vpop.xlane.xlu1 %1417 }
 0x8ac   : > { %2850 = vrcp.f32 %v1418_v29 }
 0x8ae   : > { %v2849_v30 = vpop.eup %2848 }
 0x8af   : > { %v1421_v31 = vmul.f32 %v2849_v30, %v2845_v23  ;;  %v1519_v38 = vpop.permute.xlu1 %1518  ;;  %v2825_v23 = vld [vmem:[%s3392_s23 + $0x8] sm:$0xff]  }
 0x8b1   : > { %v1423_v33 = vpack.c.bf16 %v1421_v31, %v1421_v31 }
 0x8b3   : > { %2626 = vmatmul.mubr.msk.bf16.vlgmr.msra.gmra.mrb[0].mxu0 %vm1400_vm6, %v1423_v33  ;;  %v1569_v40 = vpop.permute.xlu1 %1568 }
 0x8b4   : > { %2636 = vmatpush3.bf16.xpose.msra.mxu0 %v1526_v34  ;;  %2637 = vmatprep.mubr.msk.bf16.mxu0 %vm3078_vm3, %v3077_v52 }
 0x8b5   : > { %2647 = vmatprep.subr.bf16.mxu0 %v3077_v52 }
 0x8b6   : > { %v2851_v35 = vpop.eup %2850 }
 0x8b7   : > { %v1422_v36 = vmul.f32 %v2851_v35, %v2847_v25  ;;  %v2827_v25 = vld [vmem:[%s3392_s23 + $0x18] sm:$0xff]   ;;  %s3786_s23 = sld [smem:[#allocation28_spill]] (!%p2554_p2) }
 0x8b9   : > { %v1424_v37 = vpack.c.bf16 %v1422_v36, %v1422_v36 }
 0x8bb   : > { %2632 = vmatmul.mubr.msk.bf16.vlgmr.msra.gmra.mrb[12].mxu1 %vm1400_vm6, %v1424_v37  ;;  %2638 = vmatmul.mubr.msk.bf16.vlgmr.msra.gmra.mrb[4].mxu0 %vm1302_vm5, %v1519_v38 }
 0x8bc   : > { %2642 = vmatpush3.bf16.xpose.msra.mxu1 %v1576_v39  ;;  %2643 = vmatprep.mubr.msk.bf16.mxu1 %vm3078_vm3, %v3077_v52 }
 0x8bd   : > { %2653 = vmatprep.subr.bf16.mxu1 %v3077_v52  ;;  %2649 = vmatprep.mubr.msk.bf16.mxu0 %vm3078_vm3, %v3077_v52 }
 0x8c3   : > { %2644 = vmatmul.mubr.msk.bf16.vlgmr.msra.gmra.mrb[16].mxu1 %vm1302_vm5, %v1569_v40 }
 0x8c4   : > { %2655 = vmatprep.mubr.msk.bf16.mxu1 %vm3078_vm3, %v3077_v52 }
 0x986   : > { %v3555_v41 = vpop.f32.mrb[0].mxu0 }
 0x987   : > { %v2627_v42 = vpop.f32.mrb[1].mxu0 }
 0x988   : > { %v1469_v43 = vpop.f32.mrb[2].mxu0 }
 0x989   : > { %v2628_v44 = vpop.f32.mrb[3].mxu0 }
 0x98e   : > { %v3557_v45 = vpop.f32.mrb[12].mxu1  ;;  %v1562_v46 = vpop.f32.mrb[4].mxu0 }
 0x98f   : > { %v1618_v47 = vmul.f32 0.17677669, %v1562_v46  ;;  %v2633_v48 = vpop.f32.mrb[13].mxu1  ;;  %v2639_v49 = vpop.f32.mrb[5].mxu0 }
 0x990   : > { %v1515_v50 = vpop.f32.mrb[14].mxu1  ;;  %v1565_v51 = vpop.f32.mrb[6].mxu0 }
 0x991   : > { %v2634_v53 = vpop.f32.mrb[15].mxu1  ;;  %v2640_v54 = vpop.f32.mrb[7].mxu0  ;;  %v1620_v55 = vsel %vm1400_vm6, %v1618_v47, -inf }
 0x992   : > { %1621 = vmax.xlane.f32.xlu0 %v1620_v55 }
 0x996   : > { %v1612_v57 = vpop.f32.mrb[16].mxu1 }
 0x997   : > { %v1619_v58 = vmul.f32 0.17677669, %v1612_v57  ;;  %v2645_v59 = vpop.f32.mrb[17].mxu1 }
 0x998   : > { %v1615_v60 = vpop.f32.mrb[18].mxu1  ;;  %v2828_v59 = vld [vmem:[%s3405_s30] sm:$0xff]  }
 0x999   : > { %v2646_v61 = vpop.f32.mrb[19].mxu1  ;;  %v1623_v62 = vsel %vm1400_vm6, %v1619_v58, -inf  ;;  %v2829_v60 = vld [vmem:[%s3405_s30 + $0x8] sm:$0xff]  }
 0x99a   : > { %1624 = vmax.xlane.f32.xlu1 %v1623_v62  ;;  %v2830_v61 = vld [vmem:[%s3405_s30 + $0x10] sm:$0xff]   ;;  %v2831_v62 = vld [vmem:[%s3405_s30 + $0x18] sm:$0xff]   ;;  %s3785_s30 = scalar_lea.vmem %s3720_s13, %s3372_s5 }
 0x9ab   : > { %1694 = vrot.lane.b32.xlu1 %v3523_v1, %s3081_s22 }
 0xa1f   : > { %v1622_v63 = vpop.xlane.xlu0 %1621 }
 0xa20   : > { %v1626_v0 = vsub.f32 %v1618_v47, %v1622_v63 }
 0xa22   : > { %v1628_v2 = vmul.f32 1.442695, %v1626_v0 }
 0xa24   : > { %2852 = vpow2.f32 %v1628_v2 }
 0xa27   : > { %v1625_v3 = vpop.xlane.xlu1 %1624 }
 0xa28   : > { %v1627_v4 = vsub.f32 %v1619_v58, %v1625_v3 }
 0xa2a   : > { %v1630_v5 = vmul.f32 1.442695, %v1627_v4 }
 0xa2b   : > { %v1695_v6 = vpop.permute.xlu1 %1694 }
 0xa2c   : > { %2854 = vpow2.f32 %v1630_v5  ;;  %v1700_v7 = vsel %vm1428_vm4, %v1695_v6, 0 }
 0xa2d   : > { %2654 = vmatpush3.bf16.msra.mxu1 %v1700_v7 }
 0xa2e   : > { %v2853_v8 = vpop.eup %2852  ;;  %2671 = vmatprep.subr.bf16.mxu1 %v3077_v52 }
 0xa2f   : > { %v1632_v9 = vsel %vm1400_vm6, %v2853_v8, 0.0 }
 0xa30   : > { %1633 = vadd.xlane.f32.xlu0 %v1632_v9 }
 0xa36   : > { %v2855_v10 = vpop.eup %2854 }
 0xa37   : > { %v1635_v1 = vsel %vm1400_vm6, %v2855_v10, 0.0 }
 0xa38   : > { %1636 = vadd.xlane.f32.xlu0 %v1635_v1 }
 0xa4e   : > { %1645 = vrot.lane.b32.xlu0 %v3511_v56, %s3081_s22 }
 0xabd   : > { %v1634_v11 = vpop.xlane.xlu0 %1633 }
 0xabe   : > { %2856 = vrcp.f32 %v1634_v11  ;;  %v2538_v11 = vld [vmem:[%s887_s29] ss:$0 sm:$0xff] }
 0xac5   : > { %v1637_v14 = vpop.xlane.xlu0 %1636 }
 0xac6   : > { %2858 = vrcp.f32 %v1637_v14 }
 0xac8   : > { %v2857_v15 = vpop.eup %2856 }
 0xac9   : > { %v1640_v16 = vmul.f32 %v2857_v15, %v2853_v8  ;;  %v1646_v17 = vpop.permute.xlu0 %1645  ;;  %v2537_v8 = vld [vmem:[%s3785_s30] ss:$0 sm:$0xff] }
 0xaca   : > { %v1651_v18 = vsel %vm1428_vm4, %v1646_v17, 0 }
 0xacb   : > { %2648 = vmatpush3.bf16.msra.mxu0 %v1651_v18  ;;  %v1642_v19 = vpack.c.bf16 %v1640_v16, %v1640_v16  ;;  %v2832_v18 = vld [vmem:[%s3414_s12] sm:$0xff]  }
 0xacc   : > { %2659 = vmatprep.subr.bf16.mxu0 %v3077_v52 }
 0xace   : > { %2650 = vmatmul.mubr.msk.bf16.vlgmr.msra.gmra.mrb[8].mxu0 %vm1400_vm6, %v1642_v19  ;;  %v2833_v19 = vld [vmem:[%s3414_s12 + $0x8] sm:$0xff]  }
 0xacf   : > { %2667 = vmatprep.mubr.msk.bf16.mxu0 %vm3078_vm3, %v3077_v52  ;;  %2660 = vmatpush3.bf16.msra.mxu0 %v2824_v22  ;;  %v2837_v22 = vld [vmem:[%s3414_s12 + $0x28] sm:$0xff]  }
 0xad0   : > { %v2859_v56 = vpop.eup %2858  ;;  %2661 = vmatprep.subr.bf16.mxu0 %v3077_v52 }
 0xad1   : > { %v1641_v20 = vmul.f32 %v2859_v56, %v2855_v10  ;;  %v2834_v56 = vld [vmem:[%s3414_s12 + $0x10] sm:$0xff]  }
 0xad3   : > { %v1643_v21 = vpack.c.bf16 %v1641_v20, %v1641_v20  ;;  %2662 = vmatpush3.bf16.msra.mxu0 %v2825_v23  ;;  %v2835_v20 = vld [vmem:[%s3414_s12 + $0x18] sm:$0xff]   ;;  %v2838_v23 = vld [vmem:[%s3414_s12 + $0x30] sm:$0xff]  }
 0xad4   : > { %2663 = vmatprep.subr.bf16.mxu0 %v3077_v52 }
 0xad5   : > { %2656 = vmatmul.mubr.msk.bf16.vlgmr.msra.gmra.mrb[20].mxu1 %vm1400_vm6, %v1643_v21  ;;  %v2836_v21 = vld [vmem:[%s3414_s12 + $0x20] sm:$0xff]  }
 0xad6   : > { %2679 = vmatprep.mubr.msk.bf16.mxu1 %vm3078_vm3, %v3077_v52  ;;  %2672 = vmatpush3.bf16.msra.mxu1 %v2828_v59 }
 0xad7   : > { %2664 = vmatpush3.bf16.msra.mxu0 %v2826_v24  ;;  %2673 = vmatprep.subr.bf16.mxu1 %v3077_v52  ;;  %v2839_v24 = vld [vmem:[%s3414_s12 + $0x38] sm:$0xff]  }
 0xad8   : > { %2665 = vmatprep.subr.bf16.mxu0 %v3077_v52 }
 0xada   : > { %2674 = vmatpush3.bf16.msra.mxu1 %v2829_v60 }
 0xadb   : > { %2666 = vmatpush3.bf16.msra.mxu0 %v2827_v25  ;;  %2675 = vmatprep.subr.bf16.mxu1 %v3077_v52  ;;  %v2539_v25 = vld [vmem:[%s895_s11] ss:$0 sm:$0xff] }
 0xadc   : > { %2683 = vmatprep.subr.bf16.mxu0 %v3077_v52 }
 0xade   : > { %2676 = vmatpush3.bf16.msra.mxu1 %v2830_v61 }
 0xadf   : > { %2677 = vmatprep.subr.bf16.mxu1 %v3077_v52 }
 0xae2   : > { %2678 = vmatpush3.bf16.msra.mxu1 %v2831_v62 }
 0xba1   : > { %v1687_v26 = vpop.f32.mrb[8].mxu0 }
 0xba2   : > { %v2651_v27 = vpop.f32.mrb[9].mxu0 }
 0xba3   : > { %v1690_v28 = vpop.f32.mrb[10].mxu0 }
 0xba4   : > { %v2652_v29 = vpop.f32.mrb[11].mxu0 }
 0xba8   : > { %v1736_v30 = vpop.f32.mrb[20].mxu1 }
 0xba9   : > { %v2807_v31 = vpack.i.bf16 %v1736_v30, %v1687_v26  ;;  %v2657_v32 = vpop.f32.mrb[21].mxu1 }
 0xbaa   : > { %v1739_v33 = vpop.f32.mrb[22].mxu1 }
 0xbab   : > { %2808 = vrot.lane.b32.xlu1 %v2807_v31, %s3080_s19  ;;  %v2658_v34 = vpop.f32.mrb[23].mxu1 }
 0xc1d   : > { %v2809_v35 = vpop.permute.xlu1 %2808 }
 0xc1e   : > { %v2811_v36 = vunpack.i.h.bf16 %v2809_v35  ;;  %v2810_v37 = vunpack.i.l.bf16 %v2809_v35 }
 0xc20   : > { %v1751_v38 = vsel %vm1302_vm5, %v3557_v45, %v2811_v36  ;;  %v1750_v39 = vsel %vm1302_vm5, %v3555_v41, %v2810_v37 }
 0xc21   : > { %v1752_v40 = vpack.c.bf16 %v1751_v38, %v1750_v39 }
 0xc23   : > { %2668 = vmatmul.mubr.msk.bf16.vlgmr.msra.gmra.mrb[12].mxu0 %vm1156_vm2, %v1752_v40 }
 0xc24   : > { %2699 = vmatprep.mubr.msk.bf16.mxu0 %vm3078_vm3, %v3077_v52  ;;  %2684 = vmatpush3.bf16.msra.mxu0 %v2832_v18 }
 0xc25   : > { %2685 = vmatprep.subr.bf16.mxu0 %v3077_v52 }
 0xc28   : > { %2686 = vmatpush3.bf16.msra.mxu0 %v2833_v19 }
 0xc29   : > { %2687 = vmatprep.subr.bf16.mxu0 %v3077_v52 }
 0xc2c   : > { %2688 = vmatpush3.bf16.msra.mxu0 %v2834_v56 }
 0xc2d   : > { %2689 = vmatprep.subr.bf16.mxu0 %v3077_v52 }
 0xc30   : > { %2690 = vmatpush3.bf16.msra.mxu0 %v2835_v20 }
 0xc31   : > { %2691 = vmatprep.subr.bf16.mxu0 %v3077_v52 }
 0xc34   : > { %2692 = vmatpush3.bf16.msra.mxu0 %v2836_v21 }
 0xc35   : > { %2693 = vmatprep.subr.bf16.mxu0 %v3077_v52 }
 0xc38   : > { %2694 = vmatpush3.bf16.msra.mxu0 %v2837_v22 }
 0xc39   : > { %2695 = vmatprep.subr.bf16.mxu0 %v3077_v52 }
 0xc3c   : > { %2696 = vmatpush3.bf16.msra.mxu0 %v2838_v23  ;;  %v2553_v23 = vld [vmem:[%s903_s1] ss:$0 sm:$0xff] }
 0xc3d   : > { %2697 = vmatprep.subr.bf16.mxu0 %v3077_v52 }
 0xc40   : > { %2698 = vmatpush3.bf16.msra.mxu0 %v2839_v24 }
 0xcf6   : > { %v1822_v42 = vpop.f32.mrb[12].mxu0 }
 0xcf7   : > { %v3594_v43 = vadd.f32 %v1822_v42, %v3474_v12  ;;  %v2669_v44 = vpop.f32.mrb[13].mxu0 }
 0xcf8   : > { %v1825_v46 = vpop.f32.mrb[14].mxu0 }
 0xcf9   : > { %v3597_v47 = vadd.f32 %v1825_v46, %v3476_v13  ;;  %v2670_v48 = vpop.f32.mrb[15].mxu0  ;;  %v1833_v45 = vsel %vm1156_vm2, %v3594_v43, 0.0 }
 0xcfa   : > { %1834 = vadd.xlane.f32.xlu1 %v1833_v45 }
 0xcfb   : > { %v1836_v41 = vsel %vm1156_vm2, %v3597_v47, 0.0 }
 0xcfc   : > { %1837 = vadd.xlane.f32.xlu0 %v1836_v41 }
 0xd87   : > { %v1835_v49 = vpop.xlane.xlu1 %1834 }
 0xd88   : > { %v1839_v50 = vmul.f32 0.015625, %v1835_v49 }
 0xd89   : > { %v1838_v12 = vpop.xlane.xlu0 %1837 }
 0xd8a   : > { %v1841_v51 = vsub.f32 %v3594_v43, %v1839_v50  ;;  %v1840_v53 = vmul.f32 0.015625, %v1838_v12 }
 0xd8c   : > { %v1842_v13 = vsub.f32 %v3597_v47, %v1840_v53  ;;  %v1843_v54 = vmul.f32 %v1841_v51, %v1841_v51 }
 0xd8e   : > { %v1845_v55 = vsel %vm1156_vm2, %v1843_v54, 0.0  ;;  %v1844_v57 = vmul.f32 %v1842_v13, %v1842_v13 }
 0xd8f   : > { %1846 = vadd.xlane.f32.xlu0 %v1845_v55 }
 0xd90   : > { %v1848_v58 = vsel %vm1156_vm2, %v1844_v57, 0.0 }
 0xd93   : > { %1849 = vadd.xlane.f32.xlu0 %v1848_v58 }
 0xe1c   : > { %v1847_v63 = vpop.xlane.xlu0 %1846 }
 0xe1d   : > { %v1851_v0 = vmul.f32 0.015625, %v1847_v63 }
 0xe1f   : > { %v1853_v2 = vadd.f32 1e-05, %v1851_v0 }
 0xe20   : > { %v1850_v3 = vpop.xlane.xlu0 %1849 }
 0xe21   : > { %2860 = vrsqrt.f32 %v1853_v2  ;;  %v1852_v4 = vmul.f32 0.015625, %v1850_v3 }
 0xe23   : > { %v1854_v5 = vadd.f32 1e-05, %v1852_v4 }
 0xe25   : > { %2862 = vrsqrt.f32 %v1854_v5 }
 0xe2b   : > { %v2861_v6 = vpop.eup %2860 }
 0xe2c   : > { %v1857_v7 = vmul.f32 %v2861_v6, %v1841_v51 }
 0xe2e   : > { %v1865_v10 = vmul.f32 %v2537_v8, %v1857_v7 }
 0xe2f   : > { %v2863_v9 = vpop.eup %2862 }
 0xe30   : > { %v1858_v1 = vmul.f32 %v2863_v9, %v1842_v13  ;;  %v1873_v15 = vadd.f32 %v2538_v11, %v1865_v10 }
 0xe32   : > { %v1866_v14 = vmul.f32 %v2537_v8, %v1858_v1  ;;  %v3082_v8 = vmov -1.0  }
 0xe34   : > { %v1874_v16 = vadd.f32 %v2538_v11, %v1866_v14 }
 0xe36   : > { %v1875_v17 = vpack.c.bf16 %v1874_v16, %v1873_v15 }
 0xe38   : > { %2680 = vmatmul.mubr.msk.bf16.vlgmr.msra.gmra.mrb[24].mxu1 %vm1156_vm2, %v1875_v17 }
 0xf0b   : > { %v1952_v26 = vpop.f32.mrb[24].mxu1 }
 0xf0c   : > { %v1953_v27 = vadd.f32 %v2539_v25, %v1952_v26  ;;  %v2681_v28 = vpop.f32.mrb[25].mxu1 }
 0xf0d   : > { %v1955_v29 = vpop.f32.mrb[26].mxu1 }
 0xf0e   : > { %v1961_v30 = vmul.f32 0.70710677, %v1953_v27  ;;  %v1956_v31 = vadd.f32 %v2539_v25, %v1955_v29  ;;  %v2682_v32 = vpop.f32.mrb[27].mxu1  ;;  %v1959_v17 = vmul.f32 0.5, %v1953_v27 }
 0xf10   : > { %v1967_v33 = vand.u32 2147483647, %v1961_v30  ;;  %v1962_v34 = vmul.f32 0.70710677, %v1956_v31  ;;  %vm1963_vm7 = vcmp.ge.f32.partialorder %v1961_v30, 0.0  ;;  %v1960_v18 = vmul.f32 0.5, %v1956_v31 }
 0xf11   : > { %v1965_v9 = vsel %vm1963_vm7, 1.0, %v3082_v8 }
 0xf12   : > { %v1969_v35 = vmul.f32 0.3275911, %v1967_v33  ;;  %v1968_v36 = vand.u32 2147483647, %v1962_v34  ;;  %v1993_v39 = vsub.f32 0.0, %v1967_v33  ;;  %vm1964_vm8 = vcmp.ge.f32.partialorder %v1962_v34, 0.0 }
 0xf13   : > { %v1966_v14 = vsel %vm1964_vm8, 1.0, %v3082_v8 }
 0xf14   : > { %v1971_v37 = vadd.f32 1.0, %v1969_v35  ;;  %v1970_v52 = vmul.f32 0.3275911, %v1968_v36  ;;  %v1994_v40 = vsub.f32 0.0, %v1968_v36  ;;  %v1995_v44 = vmul.f32 %v1993_v39, %v1967_v33 }
 0xf16   : > { %2864 = vrcp.f32 %v1971_v37  ;;  %v1972_v38 = vadd.f32 1.0, %v1970_v52  ;;  %v1996_v41 = vmul.f32 %v1994_v40, %v1968_v36  ;;  %v1997_v49 = vmul.f32 1.442695, %v1995_v44  ;;  %v2872_v40 = vld [vmem:[%s3728_s21] sm:$0xff] (!%p2554_p2)   ;;  %v2873_v44 = vld [vmem:[%s3728_s21 + $0x8] sm:$0xff] (!%p2554_p2)  }
 0xf18   : > { %2866 = vrcp.f32 %v1972_v38  ;;  %v1999_v13 = vmul.f32 1.442695, %v1996_v41 }
 0xf19   : > { %2868 = vpow2.f32 %v1997_v49 }
 0xf1a   : > { %2870 = vpow2.f32 %v1999_v13  ;;  %v2555_v13 = vld [vmem:[%s3786_s23] ss:$0 sm:$0xff] (!%p2554_p2) }
 0xf20   : > { %v2865_v42 = vpop.eup %2864 }
 0xf21   : > { %v1975_v46 = vmul.f32 1.0614054, %v2865_v42 }
 0xf22   : > { %v2867_v48 = vpop.eup %2866 }
 0xf23   : > { %v1977_v45 = vadd.f32 -1.4531521, %v1975_v46  ;;  %v1976_v50 = vmul.f32 1.0614054, %v2867_v48  ;;  %v2869_v2 = vpop.eup %2868  ;;  %v2874_v46 = vld [vmem:[%s3728_s21 + $0x10] sm:$0xff] (!%p2554_p2)  }
 0xf24   : > { %v2871_v6 = vpop.eup %2870 }
 0xf25   : > { %v1979_v12 = vmul.f32 %v2865_v42, %v1977_v45  ;;  %v1978_v51 = vadd.f32 -1.4531521, %v1976_v50 }
 0xf27   : > { %v1981_v53 = vadd.f32 1.4214138, %v1979_v12  ;;  %v1980_v54 = vmul.f32 %v2867_v48, %v1978_v51 }
 0xf29   : > { %v1983_v55 = vmul.f32 %v2865_v42, %v1981_v53  ;;  %v1982_v57 = vadd.f32 1.4214138, %v1980_v54 }
 0xf2b   : > { %v1985_v58 = vadd.f32 -0.28449672, %v1983_v55  ;;  %v1984_v59 = vmul.f32 %v2867_v48, %v1982_v57  ;;  %v2556_v55 = vld [vmem:[%s3787_s27] ss:$0 sm:$0xff] (!%p2554_p2) }
 0xf2d   : > { %v1987_v60 = vmul.f32 %v2865_v42, %v1985_v58  ;;  %v1986_v61 = vadd.f32 -0.28449672, %v1984_v59 }
 0xf2f   : > { %v1989_v62 = vadd.f32 0.2548296, %v1987_v60  ;;  %v1988_v63 = vmul.f32 %v2867_v48, %v1986_v61 }
 0xf31   : > { %v1991_v0 = vmul.f32 %v2865_v42, %v1989_v62  ;;  %v1990_v3 = vadd.f32 0.2548296, %v1988_v63  ;;  %v3083_v42 = vmov (!%p2554_p2), 0.0  }
 0xf32   : > { %2703 = vmatprep.subr.bf16.mxu0 (!%p2554_p2), %v3083_v42 }
 0xf33   : > { %v2001_v4 = vmul.f32 %v2869_v2, %v1991_v0  ;;  %v1992_v5 = vmul.f32 %v2867_v48, %v1990_v3  ;;  %v2875_v48 = vld [vmem:[%s3728_s21 + $0x18] sm:$0xff] (!%p2554_p2)  }
 0xf35   : > { %v2003_v7 = vsub.f32 1.0, %v2001_v4  ;;  %v2002_v10 = vmul.f32 %v2871_v6, %v1992_v5 }
 0xf37   : > { %v2005_v1 = vmul.f32 %v2003_v7, %v1965_v9  ;;  %v2004_v11 = vsub.f32 1.0, %v2002_v10 }
 0xf39   : > { %v2007_v15 = vadd.f32 1.0, %v2005_v1  ;;  %v2006_v16 = vmul.f32 %v2004_v11, %v1966_v14 }
 0xf3b   : > { %v2008_v19 = vadd.f32 1.0, %v2006_v16  ;;  %v2009_v56 = vmul.f32 %v2007_v15, %v1959_v17 }
 0xf3d   : > { %v2010_v20 = vmul.f32 %v2008_v19, %v1960_v18 }
 0xf3f   : > { %v2011_v21 = vpack.c.bf16 %v2010_v20, %v2009_v56 }
 0xf41   : > { %2700 = vmatmul.mubr.bf16.vlgmr.msra.gmra.mrb[16].mxu0 %v2011_v21 }
 0xf42   : > { %2711 = vmatprep.mubr.msk.bf16.mxu0 (!%p2554_p2), %vm3084_vm9, %v3083_v42  ;;  %2704 = vmatpush3.bf16.msra.mxu0 (!%p2554_p2), %v2872_v40 }
 0xf43   : > { %2705 = vmatprep.subr.bf16.mxu0 (!%p2554_p2), %v3083_v42 }
 0xf46   : > { %2706 = vmatpush3.bf16.msra.mxu0 (!%p2554_p2), %v2873_v44 }
 0xf47   : > { %2707 = vmatprep.subr.bf16.mxu0 (!%p2554_p2), %v3083_v42 }
 0xf4a   : > { %2708 = vmatpush3.bf16.msra.mxu0 (!%p2554_p2), %v2874_v46 }
 0xf4b   : > { %2709 = vmatprep.subr.bf16.mxu0 (!%p2554_p2), %v3083_v42 }
 0xf4e   : > { %2710 = vmatpush3.bf16.msra.mxu0 (!%p2554_p2), %v2875_v48 }
0x1014   : > { %v2110_v22 = vpop.f32.mrb[16].mxu0 }
0x1015   : > { %v2117_v24 = vadd.f32 %v2110_v22, %v3594_v43  ;;  %v2701_v25 = vpop.f32.mrb[17].mxu0  ;;  %2133 = sbr.rel (%p2554_p2) target bundleno = 4675 (0x1243), region = 140  ;;  %v2557_v22 = vld [vmem:[%s3788_s3] ss:$0 sm:$0xff] (!%p2554_p2) }
0x1016   : > { %v2113_v26 = vpop.f32.mrb[18].mxu0 }
0x1017   : > { %v2126_v28 = vadd.f32 %v2553_v23, %v2117_v24  ;;  %v2118_v29 = vadd.f32 %v2113_v26, %v3597_v47  ;;  %v2702_v27 = vpop.f32.mrb[19].mxu0 }
0x1019   : > { %2128 = vst.msk [vmem:[#allocation2] sm:$0xff] %vm1156_vm2, %v2126_v28  ;;  %v2127_v30 = vadd.f32 %v2553_v23, %v2118_v29  ;;  %v2136_v31 = vsel (!%p2554_p2), %vm1156_vm2, %v2126_v28, 0.0 }
0x101a   : > { %2137 = vadd.xlane.f32.xlu0 (!%p2554_p2), %v2136_v31 }
0x101b   : > { %2129 = vst.msk [vmem:[#allocation2 + $0x8] sm:$0xff] %vm1156_vm2, %v2127_v30  ;;  %v2139_v32 = vsel (!%p2554_p2), %vm1156_vm2, %v2127_v30, 0.0 }
0x101e   : > { %2140 = vadd.xlane.f32.xlu0 %v2139_v32 }
0x10a7   : > { %v2138_v43 = vpop.xlane.xlu0 %2137 }
0x10a8   : > { %v2142_v33 = vmul.f32 0.015625, %v2138_v43 }
0x10aa   : > { %v2144_v34 = vsub.f32 %v2126_v28, %v2142_v33 }
0x10ab   : > { %v2141_v35 = vpop.xlane.xlu0 %2140 }
0x10ac   : > { %v2143_v47 = vmul.f32 0.015625, %v2141_v35  ;;  %v2146_v36 = vmul.f32 %v2144_v34, %v2144_v34 }
0x10ae   : > { %v2145_v37 = vsub.f32 %v2127_v30, %v2143_v47  ;;  %v2148_v52 = vsel %vm1156_vm2, %v2146_v36, 0.0 }
0x10af   : > { %2149 = vadd.xlane.f32.xlu1 %v2148_v52 }
0x10b0   : > { %v2147_v38 = vmul.f32 %v2145_v37, %v2145_v37 }
0x10b2   : > { %v2151_v39 = vsel %vm1156_vm2, %v2147_v38, 0.0 }
0x10b3   : > { %2152 = vadd.xlane.f32.xlu1 %v2151_v39 }
0x113c   : > { %v2150_v45 = vpop.xlane.xlu1 %2149 }
0x113d   : > { %v2154_v41 = vmul.f32 0.015625, %v2150_v45 }
0x113f   : > { %v2156_v49 = vadd.f32 1e-05, %v2154_v41 }
0x1140   : > { %v2153_v50 = vpop.xlane.xlu1 %2152 }
0x1141   : > { %2876 = vrsqrt.f32 %v2156_v49  ;;  %v2155_v12 = vmul.f32 0.015625, %v2153_v50 }
0x1143   : > { %v2157_v51 = vadd.f32 1e-05, %v2155_v12 }
0x1145   : > { %2878 = vrsqrt.f32 %v2157_v51 }
0x114b   : > { %v2877_v53 = vpop.eup %2876 }
0x114c   : > { %v2160_v54 = vmul.f32 %v2877_v53, %v2144_v34 }
0x114e   : > { %v2168_v57 = vmul.f32 %v2555_v13, %v2160_v54 }
0x114f   : > { %v2879_v58 = vpop.eup %2878 }
0x1150   : > { %v2176_v59 = vadd.f32 %v2556_v55, %v2168_v57  ;;  %v2161_v60 = vmul.f32 %v2879_v58, %v2145_v37 }
0x1152   : > { %v2169_v61 = vmul.f32 %v2555_v13, %v2161_v60  ;;  %v2179_v62 = vsel %vm2178_vm10, %v2176_v59, 0.0 }
0x1153   : > { %v2180_v63 = vrot.slane %v2179_v62, 4 }
0x1154   : > { %v2177_v0 = vadd.f32 %v2556_v55, %v2169_v61 }
0x1155   : > { %v2181_v2 = vadd.f32 %v2180_v63, %v2179_v62 }
0x1156   : > { %v2186_v3 = vsel %vm2178_vm10, %v2177_v0, 0.0 }
0x1157   : > { %v2182_v4 = vrot.slane %v2181_v2, 2  ;;  %v2187_v5 = vrot.slane %v2186_v3, 4 }
0x1159   : > { %v2183_v6 = vadd.f32 %v2182_v4, %v2181_v2  ;;  %v2188_v7 = vadd.f32 %v2187_v5, %v2186_v3 }
0x115b   : > { %v2184_v8 = vrot.slane %v2183_v6, 1  ;;  %v2189_v9 = vrot.slane %v2188_v7, 2 }
0x115d   : > { %v2185_v10 = vadd.f32 %v2184_v8, %v2183_v6  ;;  %v2190_v1 = vadd.f32 %v2189_v9, %v2188_v7 }
0x115f   : > { %v2191_v11 = vrot.slane %v2190_v1, 1  ;;  %v2194_v14 = vmul.f32 0.25, %v2185_v10 }
0x1161   : > { %v2192_v15 = vadd.f32 %v2191_v11, %v2190_v1  ;;  %v2196_v17 = vpack.c.bf16 %v2194_v14, %v2194_v14 }
0x1163   : > { %v2195_v16 = vmul.f32 0.25, %v2192_v15  ;;  %v2215_v19 = vunpack.c.l.b16 %v2196_v17 }
0x1165   : > { %v2197_v18 = vpack.c.bf16 %v2195_v16, %v2195_v16 }
0x1167   : > { %v2216_v56 = vunpack.c.l.b16 %v2197_v18 }
0x1169   : > { %v2218_v20 = vsel %vm2217_vm11, %v2216_v56, %v2215_v19 }
0x116a   : > { %v2219_v21 = vpack.c.b16 %v2218_v20, %v2218_v20 }
0x116c   : > { %2712 = vmatmul.mubr.msk.bf16.vlgmr.msra.gmra.mrb[0].mxu0 %vm1156_vm2, %v2219_v21 }
0x123f   : > { %v2281_v23 = vpop.f32.mrb[0].mxu0 }
0x1240   : > { %v2282_v24 = vadd.f32 %v2557_v22, %v2281_v23  ;;  %v2713_v25 = vpop.f32.mrb[1].mxu0 }
0x1241   : > { %v2284_v26 = vpop.f32.mrb[2].mxu0 }
0x1242   : > { %2287 = vst [vmem:[#allocation12] sm:$0x3] %v2282_v24  ;;  %v2714_v28 = vpop.f32.mrb[3].mxu0 }
0x1243 PF: > { %p2765_p11 = scmp.eq.s32.totalorder %s3212_s25, 1  ;;  %s3085_s11 = smov [#allocation12]  }
0x1244   : > { %s2295_s12 = sshll.u32 %s3085_s11, 4  ;;  %s2296_s12 = int_to_ptr.vmem [resolvable:$true] %s2295_s12 }
0x1245   : > { %s3020_s5 = scalar_lea.vmem %s2296_s12, 32  ;;  %p3027_p1 = scmp.lt.s32.totalorder %s2296_s12, %s2296_s12 }
0x1246   : > { %p3021_p12 = scmp.ne.s32.totalorder %s2296_s12, %s3020_s5  ;;  %p3028_p5 = scmp.lt.s32.totalorder %s3020_s5, %s3020_s5 }
0x1248   : > { %p3022_p13 = pnand %p3021_p12, %p2765_p11  ;;  %p3029_p8 = por %p3028_p5, %p3027_p1 }
0x124a   : > { %p3023_p0 = pneg %p3022_p13 }
0x124c   : > { %p3030_p7 = pnand %p3029_p8, %p3023_p0 }
0x124e   : > { %3033 = shalt.err (!%p3030_p7)
}
0x124f   : > { %s3789_s4 = sld [smem:[#allocation31_spill]] }
0x1255   : > { %s3790_s28 = smov %s3789_s4  ;;  %s3034_s24 = scalar_lea.hbm %s3789_s4, 32 }
0x1256   : > { %p3035_p3 = scmp.ne.s32.totalorder %s3790_s28, %s3034_s24  ;;  %p3040_p9 = scmp.lt.u32.totalorder %s3034_s24, %s3790_s28 }
0x1258   : > { %p3036_p4 = pnand %p3035_p3, %p2765_p11 }
0x125a   : > { %p3037_p6 = pneg %p3036_p4 }
0x125c   : > { %p3042_p10 = pnand %p3040_p9, %p3037_p6 }
0x125e   : > { %3045 = shalt.err (!%p3042_p10)
}
0x125f   : > { %2736 = dma.vmem_to_hbm [thread:$0]  (%p2765_p11), %s2296_s12, 32, %s3790_s28, [#allocation5]  }
0x1260   : > { %3063 = dma.done.wait (%p2765_p11), [#allocation5], 32  }
0x1261   : > { %3065 = vsyncadd (%p2765_p11), [#allocation5], 4294967264 }
0x1262 PF: > { %s3791_s30 = sld [smem:[#allocation17_spill]] }
0x1268   : > { %s37_s4 = sadd.s32 1, %s3791_s30  }
0x1269   : > { %p34_p2 = scmp.ge.s32.totalorder %s37_s4, 4  }
0x126b   :  { %36 = sbr.rel (!%p34_p2) target bundleno = 19 (0x13), region = 195 }
0x1272   :  { %2308 = vsyncpa [#allocation4], 1 }
0x1273   :  { %2310 = vsyncpa [#allocation4 + $0x1], 1 }
0x1274   :  { %2311 = vsyncpa [#allocation7], 1 }
0x1275   :  { %2312 = vsyncpa [#allocation10], 1 }
0x1276   :  { %2313 = vsyncpa [#allocation5], 1 }
0x1277   :  { %2315 = vsyncpa [#allocation5 + $0x1], 1 }

</bundles_post_ra>
